<compile_context>
chip_gen: v6e
topology: v6e:2x2x1
jax: 0.10.0
libtpu: 0.0.40
codegen_flags: <defaults>
</compile_context>

<pallas_src>
import functools
import math

import jax
import jax.numpy as jnp
from jax import lax
from jax.experimental import pallas as pl
from jax.experimental.pallas import tpu as pltpu

B = 2
S = 8
M = B * S                        # 16 flattened tokens
INPUT_DIM = 16
HIDDEN_DIM = 32
OUTPUT_DIM = 8
NUM_BLOCKS = 5
BOTTLENECK = 64
NUM_HEADS = 8
HEAD_DIM = HIDDEN_DIM // NUM_HEADS
LN_EPS = 1e-5
NORM_EPS = 1e-12
NEG_INF = -1e30

# ---------------- packed-operand layout (static row offsets) -----------------
# wpack: all matmul weights, bf16, lane width 96; row offsets are multiples of
# 16 (the bf16 sublane tile), so every slice is tile-aligned.
WW = 96
R_WIN = 0                                    # (16, 32)
R_WQKV = 16                                  # (32, 96)
R_WO = 48                                    # (32, 32)
R_WOUT = 80                                  # (32, 8)
R_BLK0 = 112                                 # 5 x [(32,64) w1 | (64,64) w2 | (64,32) w3]
ROWS_PER_BLK = 32 + 64 + 64                  # 160
R_WTOT = R_BLK0 + NUM_BLOCKS * ROWS_PER_BLK  # 912

# vpack: biases / LN params / precomputed attention masks, f32, lane width 96.
VW = 96
R_BIN, R_BQKV, R_BO, R_LNG, R_LNB, R_BOUT = 0, 1, 2, 3, 4, 5
R_B1, R_B2, R_B3 = 8, 16, 24                 # (5, 64), (5, 64), (5, 32)
R_OMASK = 32                                 # (8, 32)   per-head output-column mask
R_QMASK = 40                                 # (128, 32) per-head q-column mask * 1/sqrt(d)
R_BATTN = 168                                # (128, 16) additive block-diag batch mask
R_VTOT = R_BATTN + NUM_HEADS * M             # 296


def _dot(a, b):
    """MXU matmul: bf16 operands, f32 accumulation."""
    return jnp.dot(a.astype(jnp.bfloat16), b.astype(jnp.bfloat16),
                   preferred_element_type=jnp.float32)


def mlp_kernel(x_ref, w_ref, c_ref, o_ref):
    x = x_ref[...]                                            # (M, INPUT_DIM) f32

    # ---- input_layer: Linear(input_dim -> hidden_dim) ----
    h = _dot(x, w_ref[R_WIN:R_WIN + INPUT_DIM, 0:HIDDEN_DIM]) \
        + c_ref[R_BIN:R_BIN + 1, 0:HIDDEN_DIM]                # (M, H)

    # ---- nn.MultiheadAttention(hidden, 8 heads, batch_first), self-attn ----
    # Fused QKV projection: one (M, H) @ (H, 3H) matmul.
    qkv = _dot(h, w_ref[R_WQKV:R_WQKV + HIDDEN_DIM, 0:3 * HIDDEN_DIM]) \
        + c_ref[R_BQKV:R_BQKV + 1, 0:3 * HIDDEN_DIM]          # (M, 3H)
    q = qkv[:, 0:HIDDEN_DIM]
    k = qkv[:, HIDDEN_DIM:2 * HIDDEN_DIM]
    v = qkv[:, 2 * HIDDEN_DIM:3 * HIDDEN_DIM]

    # Batched heads: stack q 8x along sublanes; the precomputed qmask keeps
    # only head h's 4 feature columns in row-block h (scale folded in).
    qmask = c_ref[R_QMASK:R_QMASK + NUM_HEADS * M, 0:HIDDEN_DIM]     # (8M, H)
    q_stack = jnp.concatenate([q] * NUM_HEADS, axis=0) * qmask       # (8M, H)

    # All head scores in ONE matmul: (8M, H) x (M, H)^T -> (8M, M).
    s = lax.dot_general(q_stack.astype(jnp.bfloat16), k.astype(jnp.bfloat16),
                        (((1,), (1,)), ((), ())),
                        preferred_element_type=jnp.float32)
    s = s + c_ref[R_BATTN:R_BATTN + NUM_HEADS * M, 0:M]       # batch block-diag bias

    # ONE softmax chain for all heads (denominator reciprocal on the EUP).
    s = s - jnp.max(s, axis=-1, keepdims=True)
    p = jnp.exp(s)
    p = p * pl.reciprocal(jnp.sum(p, axis=-1, keepdims=True), approx=True)

    # ONE matmul against v, then static-masked recombination of head blocks.
    pv = _dot(p, v)                                           # (8M, H)
    omask = c_ref[R_OMASK:R_OMASK + NUM_HEADS, 0:HIDDEN_DIM]  # (8, H)
    o_concat = jnp.sum(pv.reshape(NUM_HEADS, M, HIDDEN_DIM) * omask[:, None, :],
                       axis=0)                                # (M, H)

    attn = _dot(o_concat, w_ref[R_WO:R_WO + HIDDEN_DIM, 0:HIDDEN_DIM]) \
        + c_ref[R_BO:R_BO + 1, 0:HIDDEN_DIM]

    # ---- LayerNorm(hidden_dim) ----
    mu = jnp.mean(attn, axis=-1, keepdims=True)
    var = jnp.mean((attn - mu) ** 2, axis=-1, keepdims=True)
    h = (attn - mu) * lax.rsqrt(var + LN_EPS) \
        * c_ref[R_LNG:R_LNG + 1, 0:HIDDEN_DIM] + c_ref[R_LNB:R_LNB + 1, 0:HIDDEN_DIM]

    # ---- residual bottleneck blocks (nn.Dropout == identity in eval mode) ----
    for blk in range(NUM_BLOCKS):
        r0 = R_BLK0 + blk * ROWS_PER_BLK
        w1 = w_ref[r0:r0 + HIDDEN_DIM, 0:BOTTLENECK]          # (32, 64)
        w2 = w_ref[r0 + 32:r0 + 96, 0:BOTTLENECK]             # (64, 64)
        w3 = w_ref[r0 + 96:r0 + 160, 0:HIDDEN_DIM]            # (64, 32)
        r = jnp.maximum(_dot(h, w1) + c_ref[R_B1 + blk:R_B1 + blk + 1, 0:BOTTLENECK], 0.0)
        r = jnp.maximum(_dot(r, w2) + c_ref[R_B2 + blk:R_B2 + blk + 1, 0:BOTTLENECK], 0.0)
        r = _dot(r, w3) + c_ref[R_B3 + blk:R_B3 + blk + 1, 0:HIDDEN_DIM]
        h = h + r

    # ---- F.normalize(p=2, dim=-1), eps=1e-12 ----
    ss = jnp.sum(h * h, axis=-1, keepdims=True)
    h = h * lax.rsqrt(jnp.maximum(ss, NORM_EPS * NORM_EPS))

    # ---- output_layer: Linear(hidden_dim -> output_dim), one store ----
    o_ref[...] = _dot(h, w_ref[R_WOUT:R_WOUT + HIDDEN_DIM, 0:OUTPUT_DIM]) \
        + c_ref[R_BOUT:R_BOUT + 1, 0:OUTPUT_DIM]


def mlp_forward(x, wpack, vpack):
    x2d = x.reshape(M, INPUT_DIM)                             # free XLA reshape
    out = pl.pallas_call(
        mlp_kernel,
        out_shape=jax.ShapeDtypeStruct((M, OUTPUT_DIM), jnp.float32),
        in_specs=[pl.BlockSpec(memory_space=pltpu.MemorySpace.VMEM)] * 3,
        out_specs=pl.BlockSpec(memory_space=pltpu.MemorySpace.VMEM),
        cost_estimate=pl.CostEstimate(
            flops=1_750_000, transcendentals=2_300, bytes_accessed=300_000),
        compiler_params=pltpu.CompilerParams(
            vmem_limit_bytes=4 * 1024 * 1024),
    )(x2d, wpack, vpack)
    return out.reshape(B, S, OUTPUT_DIM)


def init_params(key):
    keys = iter(jax.random.split(key, 24))

    def w(shape, scale=0.1):
        return (scale * jax.random.normal(next(keys), shape)).astype(jnp.float32)

    # PyTorch-shaped parameters (Linear weight is (out_features, in_features)).
    W_in = w((HIDDEN_DIM, INPUT_DIM)); b_in = w((HIDDEN_DIM,))
    in_proj_w = w((3 * HIDDEN_DIM, HIDDEN_DIM)); in_proj_b = w((3 * HIDDEN_DIM,))
    out_proj_w = w((HIDDEN_DIM, HIDDEN_DIM)); out_proj_b = w((HIDDEN_DIM,))
    ln_g = jnp.ones((HIDDEN_DIM,), jnp.float32)
    ln_b = jnp.zeros((HIDDEN_DIM,), jnp.float32)
    W1 = w((NUM_BLOCKS, BOTTLENECK, HIDDEN_DIM)); b1 = w((NUM_BLOCKS, BOTTLENECK))
    W2 = w((NUM_BLOCKS, BOTTLENECK, BOTTLENECK)); b2 = w((NUM_BLOCKS, BOTTLENECK))
    W3 = w((NUM_BLOCKS, HIDDEN_DIM, BOTTLENECK)); b3 = w((NUM_BLOCKS, HIDDEN_DIM))
    W_out = w((OUTPUT_DIM, HIDDEN_DIM)); b_out = w((OUTPUT_DIM,))

    # Math layout (kernel / reference compute `h @ W`).  Matmul weights are
    # rounded to bf16 ONCE here; the kernel streams bf16, the reference
    # upcasts the same rounded values, so both see identical parameters.
    def q16(a):
        return a.astype(jnp.bfloat16).astype(jnp.float32)

    kp = dict(
        win=q16(W_in.T), bin=b_in,
        wqkv=q16(in_proj_w.T), bqkv=in_proj_b,     # head h of Q owns cols [4h, 4h+4)
        wo=q16(out_proj_w.T), bo=out_proj_b,
        lng=ln_g, lnb=ln_b,
        w1=q16(W1.transpose(0, 2, 1)), b1=b1,
        w2=q16(W2.transpose(0, 2, 1)), b2=b2,
        w3=q16(W3.transpose(0, 2, 1)), b3=b3,
        wout=q16(W_out.T), bout=b_out,
    )

    # ---- packed bf16 weight buffer ----
    wpack = jnp.zeros((R_WTOT, WW), jnp.bfloat16)

    def put_w(buf, row, a):
        return buf.at[row:row + a.shape[0], 0:a.shape[1]].set(a.astype(jnp.bfloat16))

    wpack = put_w(wpack, R_WIN, kp["win"])
    wpack = put_w(wpack, R_WQKV, kp["wqkv"])
    wpack = put_w(wpack, R_WO, kp["wo"])
    wpack = put_w(wpack, R_WOUT, kp["wout"])
    for blk in range(NUM_BLOCKS):
        r0 = R_BLK0 + blk * ROWS_PER_BLK
        wpack = put_w(wpack, r0, kp["w1"][blk])
        wpack = put_w(wpack, r0 + 32, kp["w2"][blk])
        wpack = put_w(wpack, r0 + 96, kp["w3"][blk])

    # ---- packed f32 vector / mask buffer ----
    vpack = jnp.zeros((R_VTOT, VW), jnp.float32)

    def put_v(buf, row, a):
        a = jnp.atleast_2d(a.astype(jnp.float32))
        return buf.at[row:row + a.shape[0], 0:a.shape[1]].set(a)

    vpack = put_v(vpack, R_BIN, kp["bin"])
    vpack = put_v(vpack, R_BQKV, kp["bqkv"])
    vpack = put_v(vpack, R_BO, kp["bo"])
    vpack = put_v(vpack, R_LNG, kp["lng"])
    vpack = put_v(vpack, R_LNB, kp["lnb"])
    vpack = put_v(vpack, R_BOUT, kp["bout"])
    vpack = put_v(vpack, R_B1, kp["b1"])
    vpack = put_v(vpack, R_B2, kp["b2"])
    vpack = put_v(vpack, R_B3, kp["b3"])

    # Precomputed attention masks (the q mask carries the 1/sqrt(d) scale).
    col_head = jnp.arange(HIDDEN_DIM) // HEAD_DIM                       # (H,)
    row_head = jnp.repeat(jnp.arange(NUM_HEADS), M)                     # (8M,)
    scale = 1.0 / math.sqrt(HEAD_DIM)
    qmask = (row_head[:, None] == col_head[None, :]).astype(jnp.float32) * scale
    omask = (jnp.arange(NUM_HEADS)[:, None] == col_head[None, :]).astype(jnp.float32)
    tok_b = jnp.arange(M) // S
    bmask = jnp.where(tok_b[:, None] == tok_b[None, :], 0.0, NEG_INF)   # (M, M)
    battn = jnp.tile(bmask, (NUM_HEADS, 1))                             # (8M, M)

    vpack = put_v(vpack, R_OMASK, omask)
    vpack = put_v(vpack, R_QMASK, qmask)
    vpack = put_v(vpack, R_BATTN, battn)

    return wpack, vpack, kp


def reference_forward(x, kp):
    """Plain-JAX reference (mirrors the PyTorch forward in eval mode)."""
    hp = jax.lax.Precision.HIGHEST
    dot = functools.partial(jnp.dot, precision=hp)

    h = dot(x, kp["win"]) + kp["bin"]                        # (B, S, H)

    qkv = dot(h, kp["wqkv"]) + kp["bqkv"]                    # (B, S, 3H)
    q = qkv[..., 0:HIDDEN_DIM]
    k = qkv[..., HIDDEN_DIM:2 * HIDDEN_DIM]
    v = qkv[..., 2 * HIDDEN_DIM:3 * HIDDEN_DIM]
    scale = 1.0 / math.sqrt(HEAD_DIM)
    head_outs = []
    for i in range(NUM_HEADS):
        lo, hi = i * HEAD_DIM, (i + 1) * HEAD_DIM
        qi, ki, vi = q[..., lo:hi], k[..., lo:hi], v[..., lo:hi]
        s = jnp.einsum("bqd,bkd->bqk", qi, ki, precision=hp) * scale
        p = jax.nn.softmax(s, axis=-1)
        head_outs.append(jnp.einsum("bqk,bkd->bqd", p, vi, precision=hp))
    attn = dot(jnp.concatenate(head_outs, axis=-1), kp["wo"]) + kp["bo"]

    mu = jnp.mean(attn, axis=-1, keepdims=True)
    var = jnp.mean((attn - mu) ** 2, axis=-1, keepdims=True)
    h = (attn - mu) / jnp.sqrt(var + LN_EPS) * kp["lng"] + kp["lnb"]

    for blk in range(NUM_BLOCKS):
        r = jax.nn.relu(dot(h, kp["w1"][blk]) + kp["b1"][blk])
        r = jax.nn.relu(dot(r, kp["w2"][blk]) + kp["b2"][blk])
        r = dot(r, kp["w3"][blk]) + kp["b3"][blk]
        h = h + r

    norm = jnp.sqrt(jnp.sum(h * h, axis=-1, keepdims=True))
    h = h / jnp.maximum(norm, NORM_EPS)
    return dot(h, kp["wout"]) + kp["bout"]


if __name__ == "__main__":
    root = jax.random.PRNGKey(0)
    kx, kparams = jax.random.split(root)
    x = jax.random.normal(kx, (B, S, INPUT_DIM), dtype=jnp.float32)
    wpack, vpack, kp = init_params(kparams)

    out = mlp_forward(x, wpack, vpack)
    out = jax.block_until_ready(out)

    ref = reference_forward(x, kp)
    assert out.shape == (B, S, OUTPUT_DIM), out.shape
    # Kernel matmuls use bf16 operands / f32 accumulation vs. the f32 HIGHEST
    # reference; observed error is ~1e-3, bound kept loose for robustness.
    max_err = float(jnp.max(jnp.abs(out - ref)))
    assert max_err < 1e-2, f"mismatch vs reference: {max_err}"

    print("KERNEL_OK")
</pallas_src>

<mosaic_0001>
module attributes {stable_mosaic.version = 11 : i64} {
  func.func @mlp_kernel(%arg0: memref<16x16xf32, #tpu.memory_space<vmem>>, %arg1: memref<912x96xbf16, #tpu.memory_space<vmem>>, %arg2: memref<296x96xf32, #tpu.memory_space<vmem>>, %arg3: memref<16x8xf32, #tpu.memory_space<vmem>>) attributes {dimension_semantics = [], scalar_prefetch = 0 : i64, scratch_operands = 0 : i64, tpu.core_type = #tpu.core_type<tc>} {
    %c0 = arith.constant 0 : index
    %c0_0 = arith.constant 0 : index
    %0 = vector.load %arg0[%c0, %c0_0] : memref<16x16xf32, #tpu.memory_space<vmem>>, vector<16x16xf32>
    %c0_1 = arith.constant 0 : index
    %c0_2 = arith.constant 0 : index
    %1 = vector.load %arg1[%c0_1, %c0_2] : memref<912x96xbf16, #tpu.memory_space<vmem>>, vector<16x32xbf16>
    %2 = arith.truncf %0 : vector<16x16xf32> to vector<16x16xbf16>
    %cst = arith.constant dense<0.000000e+00> : vector<16x32xf32>
    %3 = tpu.matmul %2, %1, %cst {dimension_numbers = #tpu.dot_dimension_numbers<[1], [0], [0], [1], [0, 0, 1, 1], [], []>} : vector<16x16xbf16>, vector<16x32xbf16>, vector<16x32xf32> -> vector<16x32xf32>
    %c0_3 = arith.constant 0 : index
    %c0_4 = arith.constant 0 : index
    %4 = vector.load %arg2[%c0_3, %c0_4] : memref<296x96xf32, #tpu.memory_space<vmem>>, vector<1x32xf32>
    %5 = vector.broadcast %4 : vector<1x32xf32> to vector<16x32xf32>
    %6 = arith.addf %3, %5 : vector<16x32xf32>
    %c16 = arith.constant 16 : index
    %c0_5 = arith.constant 0 : index
    %7 = vector.load %arg1[%c16, %c0_5] : memref<912x96xbf16, #tpu.memory_space<vmem>>, vector<32x96xbf16>
    %8 = arith.truncf %6 : vector<16x32xf32> to vector<16x32xbf16>
    %cst_6 = arith.constant dense<0.000000e+00> : vector<16x96xf32>
    %9 = tpu.matmul %8, %7, %cst_6 {dimension_numbers = #tpu.dot_dimension_numbers<[1], [0], [0], [1], [0, 0, 1, 1], [], []>} : vector<16x32xbf16>, vector<32x96xbf16>, vector<16x96xf32> -> vector<16x96xf32>
    %c1 = arith.constant 1 : index
    %c0_7 = arith.constant 0 : index
    %10 = vector.load %arg2[%c1, %c0_7] : memref<296x96xf32, #tpu.memory_space<vmem>>, vector<1x96xf32>
    %11 = vector.broadcast %10 : vector<1x96xf32> to vector<16x96xf32>
    %12 = arith.addf %9, %11 : vector<16x96xf32>
    %13 = vector.extract_strided_slice %12 {offsets = [0, 0], sizes = [16, 32], strides = [1, 1]} : vector<16x96xf32> to vector<16x32xf32>
    %14 = vector.extract_strided_slice %12 {offsets = [0, 32], sizes = [16, 32], strides = [1, 1]} : vector<16x96xf32> to vector<16x32xf32>
    %15 = vector.extract_strided_slice %12 {offsets = [0, 64], sizes = [16, 32], strides = [1, 1]} : vector<16x96xf32> to vector<16x32xf32>
    %c40 = arith.constant 40 : index
    %c0_8 = arith.constant 0 : index
    %16 = vector.load %arg2[%c40, %c0_8] : memref<296x96xf32, #tpu.memory_space<vmem>>, vector<128x32xf32>
    %17 = tpu.concatenate %13, %13, %13, %13, %13, %13, %13, %13 in 0 : vector<16x32xf32>, vector<16x32xf32>, vector<16x32xf32>, vector<16x32xf32>, vector<16x32xf32>, vector<16x32xf32>, vector<16x32xf32>, vector<16x32xf32> -> vector<128x32xf32>
    %18 = arith.mulf %17, %16 : vector<128x32xf32>
    %19 = arith.truncf %18 : vector<128x32xf32> to vector<128x32xbf16>
    %20 = arith.truncf %14 : vector<16x32xf32> to vector<16x32xbf16>
    %cst_9 = arith.constant dense<0.000000e+00> : vector<128x16xf32>
    %21 = tpu.matmul %19, %20, %cst_9 {dimension_numbers = #tpu.dot_dimension_numbers<[1], [1], [0], [0], [0, 0, 1, 0], [], []>} : vector<128x32xbf16>, vector<16x32xbf16>, vector<128x16xf32> -> vector<128x16xf32>
    %c168 = arith.constant 168 : index
    %c0_10 = arith.constant 0 : index
    %22 = vector.load %arg2[%c168, %c0_10] : memref<296x96xf32, #tpu.memory_space<vmem>>, vector<128x16xf32>
    %23 = arith.addf %21, %22 : vector<128x16xf32>
    %cst_11 = arith.constant dense<0xFF800000> : vector<128xf32>
    %24 = vector.multi_reduction <maximumf>, %23, %cst_11 [1] : vector<128x16xf32> to vector<128xf32>
    %25 = vector.shape_cast %24 : vector<128xf32> to vector<128x1xf32>
    %26 = vector.broadcast %25 : vector<128x1xf32> to vector<128x16xf32>
    %27 = arith.subf %23, %26 : vector<128x16xf32>
    %28 = math.exp %27 : vector<128x16xf32>
    %cst_12 = arith.constant dense<0.000000e+00> : vector<128xf32>
    %29 = vector.multi_reduction <add>, %28, %cst_12 [1] : vector<128x16xf32> to vector<128xf32>
    %30 = vector.shape_cast %29 : vector<128xf32> to vector<128x1xf32>
    %31 = tpu.reciprocal %30 {approx = true} : vector<128x1xf32> -> vector<128x1xf32>
    %32 = vector.broadcast %31 : vector<128x1xf32> to vector<128x16xf32>
    %33 = arith.mulf %28, %32 : vector<128x16xf32>
    %34 = arith.truncf %33 : vector<128x16xf32> to vector<128x16xbf16>
    %35 = arith.truncf %15 : vector<16x32xf32> to vector<16x32xbf16>
    %cst_13 = arith.constant dense<0.000000e+00> : vector<128x32xf32>
    %36 = tpu.matmul %34, %35, %cst_13 {dimension_numbers = #tpu.dot_dimension_numbers<[1], [0], [0], [1], [0, 0, 1, 1], [], []>} : vector<128x16xbf16>, vector<16x32xbf16>, vector<128x32xf32> -> vector<128x32xf32>
    %c32 = arith.constant 32 : index
    %c0_14 = arith.constant 0 : index
    %37 = vector.load %arg2[%c32, %c0_14] : memref<296x96xf32, #tpu.memory_space<vmem>>, vector<8x32xf32>
    %38 = vector.shape_cast %36 : vector<128x32xf32> to vector<8x16x32xf32>
    %39 = vector.shape_cast %37 : vector<8x32xf32> to vector<8x1x32xf32>
    %40 = vector.broadcast %39 : vector<8x1x32xf32> to vector<8x16x32xf32>
    %41 = arith.mulf %38, %40 : vector<8x16x32xf32>
    %cst_15 = arith.constant dense<0.000000e+00> : vector<16x32xf32>
    %42 = vector.multi_reduction <add>, %41, %cst_15 [0] : vector<8x16x32xf32> to vector<16x32xf32>
    %c48 = arith.constant 48 : index
    %c0_16 = arith.constant 0 : index
    %43 = vector.load %arg1[%c48, %c0_16] : memref<912x96xbf16, #tpu.memory_space<vmem>>, vector<32x32xbf16>
    %44 = arith.truncf %42 : vector<16x32xf32> to vector<16x32xbf16>
    %cst_17 = arith.constant dense<0.000000e+00> : vector<16x32xf32>
    %45 = tpu.matmul %44, %43, %cst_17 {dimension_numbers = #tpu.dot_dimension_numbers<[1], [0], [0], [1], [0, 0, 1, 1], [], []>} : vector<16x32xbf16>, vector<32x32xbf16>, vector<16x32xf32> -> vector<16x32xf32>
    %c2 = arith.constant 2 : index
    %c0_18 = arith.constant 0 : index
    %46 = vector.load %arg2[%c2, %c0_18] : memref<296x96xf32, #tpu.memory_space<vmem>>, vector<1x32xf32>
    %47 = vector.broadcast %46 : vector<1x32xf32> to vector<16x32xf32>
    %48 = arith.addf %45, %47 : vector<16x32xf32>
    %cst_19 = arith.constant dense<0.000000e+00> : vector<16xf32>
    %49 = vector.multi_reduction <add>, %48, %cst_19 [1] : vector<16x32xf32> to vector<16xf32>
    %50 = vector.shape_cast %49 : vector<16xf32> to vector<16x1xf32>
    %cst_20 = arith.constant 3.200000e+01 : f32
    %51 = vector.broadcast %cst_20 : f32 to vector<16x1xf32>
    %52 = arith.divf %50, %51 : vector<16x1xf32>
    %53 = vector.broadcast %52 : vector<16x1xf32> to vector<16x32xf32>
    %54 = arith.subf %48, %53 : vector<16x32xf32>
    %55 = arith.mulf %54, %54 : vector<16x32xf32>
    %cst_21 = arith.constant dense<0.000000e+00> : vector<16xf32>
    %56 = vector.multi_reduction <add>, %55, %cst_21 [1] : vector<16x32xf32> to vector<16xf32>
    %57 = vector.shape_cast %56 : vector<16xf32> to vector<16x1xf32>
    %cst_22 = arith.constant 3.200000e+01 : f32
    %58 = vector.broadcast %cst_22 : f32 to vector<16x1xf32>
    %59 = arith.divf %57, %58 : vector<16x1xf32>
    %60 = vector.broadcast %52 : vector<16x1xf32> to vector<16x32xf32>
    %61 = arith.subf %48, %60 : vector<16x32xf32>
    %cst_23 = arith.constant 9.99999974E-6 : f32
    %62 = vector.broadcast %cst_23 : f32 to vector<16x1xf32>
    %63 = arith.addf %59, %62 : vector<16x1xf32>
    %64 = math.rsqrt %63 : vector<16x1xf32>
    %65 = vector.broadcast %64 : vector<16x1xf32> to vector<16x32xf32>
    %66 = arith.mulf %61, %65 : vector<16x32xf32>
    %c3 = arith.constant 3 : index
    %c0_24 = arith.constant 0 : index
    %67 = vector.load %arg2[%c3, %c0_24] : memref<296x96xf32, #tpu.memory_space<vmem>>, vector<1x32xf32>
    %68 = vector.broadcast %67 : vector<1x32xf32> to vector<16x32xf32>
    %69 = arith.mulf %66, %68 : vector<16x32xf32>
    %c4 = arith.constant 4 : index
    %c0_25 = arith.constant 0 : index
    %70 = vector.load %arg2[%c4, %c0_25] : memref<296x96xf32, #tpu.memory_space<vmem>>, vector<1x32xf32>
    %71 = vector.broadcast %70 : vector<1x32xf32> to vector<16x32xf32>
    %72 = arith.addf %69, %71 : vector<16x32xf32>
    %c112 = arith.constant 112 : index
    %c0_26 = arith.constant 0 : index
    %73 = vector.load %arg1[%c112, %c0_26] : memref<912x96xbf16, #tpu.memory_space<vmem>>, vector<32x64xbf16>
    %c144 = arith.constant 144 : index
    %c0_27 = arith.constant 0 : index
    %74 = vector.load %arg1[%c144, %c0_27] : memref<912x96xbf16, #tpu.memory_space<vmem>>, vector<64x64xbf16>
    %c208 = arith.constant 208 : index
    %c0_28 = arith.constant 0 : index
    %75 = vector.load %arg1[%c208, %c0_28] : memref<912x96xbf16, #tpu.memory_space<vmem>>, vector<64x32xbf16>
    %76 = arith.truncf %72 : vector<16x32xf32> to vector<16x32xbf16>
    %cst_29 = arith.constant dense<0.000000e+00> : vector<16x64xf32>
    %77 = tpu.matmul %76, %73, %cst_29 {dimension_numbers = #tpu.dot_dimension_numbers<[1], [0], [0], [1], [0, 0, 1, 1], [], []>} : vector<16x32xbf16>, vector<32x64xbf16>, vector<16x64xf32> -> vector<16x64xf32>
    %c8 = arith.constant 8 : index
    %c0_30 = arith.constant 0 : index
    %78 = vector.load %arg2[%c8, %c0_30] : memref<296x96xf32, #tpu.memory_space<vmem>>, vector<1x64xf32>
    %79 = vector.broadcast %78 : vector<1x64xf32> to vector<16x64xf32>
    %80 = arith.addf %77, %79 : vector<16x64xf32>
    %cst_31 = arith.constant 0.000000e+00 : f32
    %81 = vector.broadcast %cst_31 : f32 to vector<16x64xf32>
    %82 = arith.maximumf %80, %81 : vector<16x64xf32>
    %83 = arith.truncf %82 : vector<16x64xf32> to vector<16x64xbf16>
    %cst_32 = arith.constant dense<0.000000e+00> : vector<16x64xf32>
    %84 = tpu.matmul %83, %74, %cst_32 {dimension_numbers = #tpu.dot_dimension_numbers<[1], [0], [0], [1], [0, 0, 1, 1], [], []>} : vector<16x64xbf16>, vector<64x64xbf16>, vector<16x64xf32> -> vector<16x64xf32>
    %c16_33 = arith.constant 16 : index
    %c0_34 = arith.constant 0 : index
    %85 = vector.load %arg2[%c16_33, %c0_34] : memref<296x96xf32, #tpu.memory_space<vmem>>, vector<1x64xf32>
    %86 = vector.broadcast %85 : vector<1x64xf32> to vector<16x64xf32>
    %87 = arith.addf %84, %86 : vector<16x64xf32>
    %cst_35 = arith.constant 0.000000e+00 : f32
    %88 = vector.broadcast %cst_35 : f32 to vector<16x64xf32>
    %89 = arith.maximumf %87, %88 : vector<16x64xf32>
    %90 = arith.truncf %89 : vector<16x64xf32> to vector<16x64xbf16>
    %cst_36 = arith.constant dense<0.000000e+00> : vector<16x32xf32>
    %91 = tpu.matmul %90, %75, %cst_36 {dimension_numbers = #tpu.dot_dimension_numbers<[1], [0], [0], [1], [0, 0, 1, 1], [], []>} : vector<16x64xbf16>, vector<64x32xbf16>, vector<16x32xf32> -> vector<16x32xf32>
    %c24 = arith.constant 24 : index
    %c0_37 = arith.constant 0 : index
    %92 = vector.load %arg2[%c24, %c0_37] : memref<296x96xf32, #tpu.memory_space<vmem>>, vector<1x32xf32>
    %93 = vector.broadcast %92 : vector<1x32xf32> to vector<16x32xf32>
    %94 = arith.addf %91, %93 : vector<16x32xf32>
    %95 = arith.addf %72, %94 : vector<16x32xf32>
    %c272 = arith.constant 272 : index
    %c0_38 = arith.constant 0 : index
    %96 = vector.load %arg1[%c272, %c0_38] : memref<912x96xbf16, #tpu.memory_space<vmem>>, vector<32x64xbf16>
    %c304 = arith.constant 304 : index
    %c0_39 = arith.constant 0 : index
    %97 = vector.load %arg1[%c304, %c0_39] : memref<912x96xbf16, #tpu.memory_space<vmem>>, vector<64x64xbf16>
    %c368 = arith.constant 368 : index
    %c0_40 = arith.constant 0 : index
    %98 = vector.load %arg1[%c368, %c0_40] : memref<912x96xbf16, #tpu.memory_space<vmem>>, vector<64x32xbf16>
    %99 = arith.truncf %95 : vector<16x32xf32> to vector<16x32xbf16>
    %cst_41 = arith.constant dense<0.000000e+00> : vector<16x64xf32>
    %100 = tpu.matmul %99, %96, %cst_41 {dimension_numbers = #tpu.dot_dimension_numbers<[1], [0], [0], [1], [0, 0, 1, 1], [], []>} : vector<16x32xbf16>, vector<32x64xbf16>, vector<16x64xf32> -> vector<16x64xf32>
    %c9 = arith.constant 9 : index
    %c0_42 = arith.constant 0 : index
    %101 = vector.load %arg2[%c9, %c0_42] : memref<296x96xf32, #tpu.memory_space<vmem>>, vector<1x64xf32>
    %102 = vector.broadcast %101 : vector<1x64xf32> to vector<16x64xf32>
    %103 = arith.addf %100, %102 : vector<16x64xf32>
    %cst_43 = arith.constant 0.000000e+00 : f32
    %104 = vector.broadcast %cst_43 : f32 to vector<16x64xf32>
    %105 = arith.maximumf %103, %104 : vector<16x64xf32>
    %106 = arith.truncf %105 : vector<16x64xf32> to vector<16x64xbf16>
    %cst_44 = arith.constant dense<0.000000e+00> : vector<16x64xf32>
    %107 = tpu.matmul %106, %97, %cst_44 {dimension_numbers = #tpu.dot_dimension_numbers<[1], [0], [0], [1], [0, 0, 1, 1], [], []>} : vector<16x64xbf16>, vector<64x64xbf16>, vector<16x64xf32> -> vector<16x64xf32>
    %c17 = arith.constant 17 : index
    %c0_45 = arith.constant 0 : index
    %108 = vector.load %arg2[%c17, %c0_45] : memref<296x96xf32, #tpu.memory_space<vmem>>, vector<1x64xf32>
    %109 = vector.broadcast %108 : vector<1x64xf32> to vector<16x64xf32>
    %110 = arith.addf %107, %109 : vector<16x64xf32>
    %cst_46 = arith.constant 0.000000e+00 : f32
    %111 = vector.broadcast %cst_46 : f32 to vector<16x64xf32>
    %112 = arith.maximumf %110, %111 : vector<16x64xf32>
    %113 = arith.truncf %112 : vector<16x64xf32> to vector<16x64xbf16>
    %cst_47 = arith.constant dense<0.000000e+00> : vector<16x32xf32>
    %114 = tpu.matmul %113, %98, %cst_47 {dimension_numbers = #tpu.dot_dimension_numbers<[1], [0], [0], [1], [0, 0, 1, 1], [], []>} : vector<16x64xbf16>, vector<64x32xbf16>, vector<16x32xf32> -> vector<16x32xf32>
    %c25 = arith.constant 25 : index
    %c0_48 = arith.constant 0 : index
    %115 = vector.load %arg2[%c25, %c0_48] : memref<296x96xf32, #tpu.memory_space<vmem>>, vector<1x32xf32>
    %116 = vector.broadcast %115 : vector<1x32xf32> to vector<16x32xf32>
    %117 = arith.addf %114, %116 : vector<16x32xf32>
    %118 = arith.addf %95, %117 : vector<16x32xf32>
    %c432 = arith.constant 432 : index
    %c0_49 = arith.constant 0 : index
    %119 = vector.load %arg1[%c432, %c0_49] : memref<912x96xbf16, #tpu.memory_space<vmem>>, vector<32x64xbf16>
    %c464 = arith.constant 464 : index
    %c0_50 = arith.constant 0 : index
    %120 = vector.load %arg1[%c464, %c0_50] : memref<912x96xbf16, #tpu.memory_space<vmem>>, vector<64x64xbf16>
    %c528 = arith.constant 528 : index
    %c0_51 = arith.constant 0 : index
    %121 = vector.load %arg1[%c528, %c0_51] : memref<912x96xbf16, #tpu.memory_space<vmem>>, vector<64x32xbf16>
    %122 = arith.truncf %118 : vector<16x32xf32> to vector<16x32xbf16>
    %cst_52 = arith.constant dense<0.000000e+00> : vector<16x64xf32>
    %123 = tpu.matmul %122, %119, %cst_52 {dimension_numbers = #tpu.dot_dimension_numbers<[1], [0], [0], [1], [0, 0, 1, 1], [], []>} : vector<16x32xbf16>, vector<32x64xbf16>, vector<16x64xf32> -> vector<16x64xf32>
    %c10 = arith.constant 10 : index
    %c0_53 = arith.constant 0 : index
    %124 = vector.load %arg2[%c10, %c0_53] : memref<296x96xf32, #tpu.memory_space<vmem>>, vector<1x64xf32>
    %125 = vector.broadcast %124 : vector<1x64xf32> to vector<16x64xf32>
    %126 = arith.addf %123, %125 : vector<16x64xf32>
    %cst_54 = arith.constant 0.000000e+00 : f32
    %127 = vector.broadcast %cst_54 : f32 to vector<16x64xf32>
    %128 = arith.maximumf %126, %127 : vector<16x64xf32>
    %129 = arith.truncf %128 : vector<16x64xf32> to vector<16x64xbf16>
    %cst_55 = arith.constant dense<0.000000e+00> : vector<16x64xf32>
    %130 = tpu.matmul %129, %120, %cst_55 {dimension_numbers = #tpu.dot_dimension_numbers<[1], [0], [0], [1], [0, 0, 1, 1], [], []>} : vector<16x64xbf16>, vector<64x64xbf16>, vector<16x64xf32> -> vector<16x64xf32>
    %c18 = arith.constant 18 : index
    %c0_56 = arith.constant 0 : index
    %131 = vector.load %arg2[%c18, %c0_56] : memref<296x96xf32, #tpu.memory_space<vmem>>, vector<1x64xf32>
    %132 = vector.broadcast %131 : vector<1x64xf32> to vector<16x64xf32>
    %133 = arith.addf %130, %132 : vector<16x64xf32>
    %cst_57 = arith.constant 0.000000e+00 : f32
    %134 = vector.broadcast %cst_57 : f32 to vector<16x64xf32>
    %135 = arith.maximumf %133, %134 : vector<16x64xf32>
    %136 = arith.truncf %135 : vector<16x64xf32> to vector<16x64xbf16>
    %cst_58 = arith.constant dense<0.000000e+00> : vector<16x32xf32>
    %137 = tpu.matmul %136, %121, %cst_58 {dimension_numbers = #tpu.dot_dimension_numbers<[1], [0], [0], [1], [0, 0, 1, 1], [], []>} : vector<16x64xbf16>, vector<64x32xbf16>, vector<16x32xf32> -> vector<16x32xf32>
    %c26 = arith.constant 26 : index
    %c0_59 = arith.constant 0 : index
    %138 = vector.load %arg2[%c26, %c0_59] : memref<296x96xf32, #tpu.memory_space<vmem>>, vector<1x32xf32>
    %139 = vector.broadcast %138 : vector<1x32xf32> to vector<16x32xf32>
    %140 = arith.addf %137, %139 : vector<16x32xf32>
    %141 = arith.addf %118, %140 : vector<16x32xf32>
    %c592 = arith.constant 592 : index
    %c0_60 = arith.constant 0 : index
    %142 = vector.load %arg1[%c592, %c0_60] : memref<912x96xbf16, #tpu.memory_space<vmem>>, vector<32x64xbf16>
    %c624 = arith.constant 624 : index
    %c0_61 = arith.constant 0 : index
    %143 = vector.load %arg1[%c624, %c0_61] : memref<912x96xbf16, #tpu.memory_space<vmem>>, vector<64x64xbf16>
    %c688 = arith.constant 688 : index
    %c0_62 = arith.constant 0 : index
    %144 = vector.load %arg1[%c688, %c0_62] : memref<912x96xbf16, #tpu.memory_space<vmem>>, vector<64x32xbf16>
    %145 = arith.truncf %141 : vector<16x32xf32> to vector<16x32xbf16>
    %cst_63 = arith.constant dense<0.000000e+00> : vector<16x64xf32>
    %146 = tpu.matmul %145, %142, %cst_63 {dimension_numbers = #tpu.dot_dimension_numbers<[1], [0], [0], [1], [0, 0, 1, 1], [], []>} : vector<16x32xbf16>, vector<32x64xbf16>, vector<16x64xf32> -> vector<16x64xf32>
    %c11 = arith.constant 11 : index
    %c0_64 = arith.constant 0 : index
    %147 = vector.load %arg2[%c11, %c0_64] : memref<296x96xf32, #tpu.memory_space<vmem>>, vector<1x64xf32>
    %148 = vector.broadcast %147 : vector<1x64xf32> to vector<16x64xf32>
    %149 = arith.addf %146, %148 : vector<16x64xf32>
    %cst_65 = arith.constant 0.000000e+00 : f32
    %150 = vector.broadcast %cst_65 : f32 to vector<16x64xf32>
    %151 = arith.maximumf %149, %150 : vector<16x64xf32>
    %152 = arith.truncf %151 : vector<16x64xf32> to vector<16x64xbf16>
    %cst_66 = arith.constant dense<0.000000e+00> : vector<16x64xf32>
    %153 = tpu.matmul %152, %143, %cst_66 {dimension_numbers = #tpu.dot_dimension_numbers<[1], [0], [0], [1], [0, 0, 1, 1], [], []>} : vector<16x64xbf16>, vector<64x64xbf16>, vector<16x64xf32> -> vector<16x64xf32>
    %c19 = arith.constant 19 : index
    %c0_67 = arith.constant 0 : index
    %154 = vector.load %arg2[%c19, %c0_67] : memref<296x96xf32, #tpu.memory_space<vmem>>, vector<1x64xf32>
    %155 = vector.broadcast %154 : vector<1x64xf32> to vector<16x64xf32>
    %156 = arith.addf %153, %155 : vector<16x64xf32>
    %cst_68 = arith.constant 0.000000e+00 : f32
    %157 = vector.broadcast %cst_68 : f32 to vector<16x64xf32>
    %158 = arith.maximumf %156, %157 : vector<16x64xf32>
    %159 = arith.truncf %158 : vector<16x64xf32> to vector<16x64xbf16>
    %cst_69 = arith.constant dense<0.000000e+00> : vector<16x32xf32>
    %160 = tpu.matmul %159, %144, %cst_69 {dimension_numbers = #tpu.dot_dimension_numbers<[1], [0], [0], [1], [0, 0, 1, 1], [], []>} : vector<16x64xbf16>, vector<64x32xbf16>, vector<16x32xf32> -> vector<16x32xf32>
    %c27 = arith.constant 27 : index
    %c0_70 = arith.constant 0 : index
    %161 = vector.load %arg2[%c27, %c0_70] : memref<296x96xf32, #tpu.memory_space<vmem>>, vector<1x32xf32>
    %162 = vector.broadcast %161 : vector<1x32xf32> to vector<16x32xf32>
    %163 = arith.addf %160, %162 : vector<16x32xf32>
    %164 = arith.addf %141, %163 : vector<16x32xf32>
    %c752 = arith.constant 752 : index
    %c0_71 = arith.constant 0 : index
    %165 = vector.load %arg1[%c752, %c0_71] : memref<912x96xbf16, #tpu.memory_space<vmem>>, vector<32x64xbf16>
    %c784 = arith.constant 784 : index
    %c0_72 = arith.constant 0 : index
    %166 = vector.load %arg1[%c784, %c0_72] : memref<912x96xbf16, #tpu.memory_space<vmem>>, vector<64x64xbf16>
    %c848 = arith.constant 848 : index
    %c0_73 = arith.constant 0 : index
    %167 = vector.load %arg1[%c848, %c0_73] : memref<912x96xbf16, #tpu.memory_space<vmem>>, vector<64x32xbf16>
    %168 = arith.truncf %164 : vector<16x32xf32> to vector<16x32xbf16>
    %cst_74 = arith.constant dense<0.000000e+00> : vector<16x64xf32>
    %169 = tpu.matmul %168, %165, %cst_74 {dimension_numbers = #tpu.dot_dimension_numbers<[1], [0], [0], [1], [0, 0, 1, 1], [], []>} : vector<16x32xbf16>, vector<32x64xbf16>, vector<16x64xf32> -> vector<16x64xf32>
    %c12 = arith.constant 12 : index
    %c0_75 = arith.constant 0 : index
    %170 = vector.load %arg2[%c12, %c0_75] : memref<296x96xf32, #tpu.memory_space<vmem>>, vector<1x64xf32>
    %171 = vector.broadcast %170 : vector<1x64xf32> to vector<16x64xf32>
    %172 = arith.addf %169, %171 : vector<16x64xf32>
    %cst_76 = arith.constant 0.000000e+00 : f32
    %173 = vector.broadcast %cst_76 : f32 to vector<16x64xf32>
    %174 = arith.maximumf %172, %173 : vector<16x64xf32>
    %175 = arith.truncf %174 : vector<16x64xf32> to vector<16x64xbf16>
    %cst_77 = arith.constant dense<0.000000e+00> : vector<16x64xf32>
    %176 = tpu.matmul %175, %166, %cst_77 {dimension_numbers = #tpu.dot_dimension_numbers<[1], [0], [0], [1], [0, 0, 1, 1], [], []>} : vector<16x64xbf16>, vector<64x64xbf16>, vector<16x64xf32> -> vector<16x64xf32>
    %c20 = arith.constant 20 : index
    %c0_78 = arith.constant 0 : index
    %177 = vector.load %arg2[%c20, %c0_78] : memref<296x96xf32, #tpu.memory_space<vmem>>, vector<1x64xf32>
    %178 = vector.broadcast %177 : vector<1x64xf32> to vector<16x64xf32>
    %179 = arith.addf %176, %178 : vector<16x64xf32>
    %cst_79 = arith.constant 0.000000e+00 : f32
    %180 = vector.broadcast %cst_79 : f32 to vector<16x64xf32>
    %181 = arith.maximumf %179, %180 : vector<16x64xf32>
    %182 = arith.truncf %181 : vector<16x64xf32> to vector<16x64xbf16>
    %cst_80 = arith.constant dense<0.000000e+00> : vector<16x32xf32>
    %183 = tpu.matmul %182, %167, %cst_80 {dimension_numbers = #tpu.dot_dimension_numbers<[1], [0], [0], [1], [0, 0, 1, 1], [], []>} : vector<16x64xbf16>, vector<64x32xbf16>, vector<16x32xf32> -> vector<16x32xf32>
    %c28 = arith.constant 28 : index
    %c0_81 = arith.constant 0 : index
    %184 = vector.load %arg2[%c28, %c0_81] : memref<296x96xf32, #tpu.memory_space<vmem>>, vector<1x32xf32>
    %185 = vector.broadcast %184 : vector<1x32xf32> to vector<16x32xf32>
    %186 = arith.addf %183, %185 : vector<16x32xf32>
    %187 = arith.addf %164, %186 : vector<16x32xf32>
    %188 = arith.mulf %187, %187 : vector<16x32xf32>
    %cst_82 = arith.constant dense<0.000000e+00> : vector<16xf32>
    %189 = vector.multi_reduction <add>, %188, %cst_82 [1] : vector<16x32xf32> to vector<16xf32>
    %190 = vector.shape_cast %189 : vector<16xf32> to vector<16x1xf32>
    %cst_83 = arith.constant 1.000000e-24 : f32
    %191 = vector.broadcast %cst_83 : f32 to vector<16x1xf32>
    %192 = arith.maximumf %190, %191 : vector<16x1xf32>
    %193 = math.rsqrt %192 : vector<16x1xf32>
    %194 = vector.broadcast %193 : vector<16x1xf32> to vector<16x32xf32>
    %195 = arith.mulf %187, %194 : vector<16x32xf32>
    %c80 = arith.constant 80 : index
    %c0_84 = arith.constant 0 : index
    %196 = vector.load %arg1[%c80, %c0_84] : memref<912x96xbf16, #tpu.memory_space<vmem>>, vector<32x8xbf16>
    %197 = arith.truncf %195 : vector<16x32xf32> to vector<16x32xbf16>
    %cst_85 = arith.constant dense<0.000000e+00> : vector<16x8xf32>
    %198 = tpu.matmul %197, %196, %cst_85 {dimension_numbers = #tpu.dot_dimension_numbers<[1], [0], [0], [1], [0, 0, 1, 1], [], []>} : vector<16x32xbf16>, vector<32x8xbf16>, vector<16x8xf32> -> vector<16x8xf32>
    %c5 = arith.constant 5 : index
    %c0_86 = arith.constant 0 : index
    %199 = vector.load %arg2[%c5, %c0_86] : memref<296x96xf32, #tpu.memory_space<vmem>>, vector<1x8xf32>
    %200 = vector.broadcast %199 : vector<1x8xf32> to vector<16x8xf32>
    %201 = arith.addf %198, %200 : vector<16x8xf32>
    %c0_87 = arith.constant 0 : index
    %c0_88 = arith.constant 0 : index
    %202 = vector.load %arg3[%c0_87, %c0_88] : memref<16x8xf32, #tpu.memory_space<vmem>>, vector<16x8xf32>
    tpu.vector_store %arg3[%c0_87, %c0_88], %201 {strides = array<i32>} : memref<16x8xf32, #tpu.memory_space<vmem>>, vector<16x8xf32>,
    return
  }
}

</mosaic_0001>

<bundles_post_ra>
// kernel: tpu_custom_call.1
= control target key start
LH: loop header
LB: loop body
LE: loop exit
PB: predicated region body
PF: predicated region fallthrough
CT: control target
= control target key end

     0   :  { %v2716_v0 = vmov 0.0   ;;  %vm2717_vm0 = vmmov 0   ;;  %vm31_vm1 = vcmask 130048   ;;  %vm98_vm2 = vcmask 261120   ;;  %s2718_s29 = smov 96   ;;  %s2719_s7 = smov 64   ;;  %s3436_s1 = inlined_call_operand.vmem [shape: bf16[912,96], index: 1, kind: input, shape index: {}]   ;;  %s3437_s0 = inlined_call_operand.vmem [shape: f32[16,16], index: 0, kind: input, shape index: {}]   ;;  %s3438_s2 = inlined_call_operand.vmem [shape: f32[296,96], index: 2, kind: input, shape index: {}]   ;;  %s3439_s3 = inlined_call_operand.vmem [shape: f32[16,8], index: 3, kind: output, shape index: {}]  }
   0x1   :  { %2354 = vmatprep.subr.bf16.mxu0 %v2716_v0  ;;  %v2586_v1 = vld [vmem:[%s3436_s1] sm:$0xff]   ;;  %2356 = vmatprep.mubr.msk.bf16.mxu0 %vm2717_vm0, %v2716_v0  ;;  %v16_v3 = vld [vmem:[%s3437_s0 + $0x8] sm:$0xff]  ;;  %v2587_v5 = vld [vmem:[%s3436_s1 + $0x10] sm:$0xff]   ;;  %vm993_vm3 = vcmask 523264   ;;  %vm2140_vm4 = vcmask 64512  }
   0x2   :  { %v15_v2 = vld [vmem:[%s3437_s0] sm:$0xff]  ;;  %2360 = vmatprep.subr.bf16.mxu1 %v2716_v0  ;;  %2364 = vmatprep.mubr.msk.bf16.mxu1 %vm2717_vm0, %v2716_v0  ;;  %v2588_v6 = vld [vmem:[%s3436_s1 + $0x8] sm:$0xff]   ;;  %v145_v19 = vld [vmem:[%s3438_s2 + $0x38] sm:$0xff] }
   0x3   :  { %2355 = vmatpush3.bf16.msra.mxu0 %v2586_v1  ;;  %v19_v4 = vpack.c.bf16 %v16_v3, %v15_v2  ;;  %2361 = vmatpush3.bf16.msra.mxu1 %v2587_v5  ;;  %v2147_v8 = vld [vmem:[%s3438_s2] ss:$0 sm:$0xff]  ;;  %v2150_v15 = vld [vmem:[%s3438_s2 + $0x1] ss:$0 sm:$0xff]  ;;  %v143_v18 = vld [vmem:[%s3438_s2 + $0x28] sm:$0xff] }
   0x4   :  { %2362 = vmatprep.subr.bf16.mxu1 %v2716_v0  ;;  %v147_v20 = vld [vmem:[%s3438_s2 + $0x48] sm:$0xff]  ;;  %v149_v22 = vld [vmem:[%s3438_s2 + $0x58] sm:$0xff]  ;;  %v144_v25 = vld [vmem:[%s3438_s2 + $0x30] sm:$0xff] }
   0x5   :  { %v151_v23 = vld [vmem:[%s3438_s2 + $0x68] sm:$0xff]  ;;  %v153_v24 = vld [vmem:[%s3438_s2 + $0x78] sm:$0xff]  ;;  %v146_v30 = vld [vmem:[%s3438_s2 + $0x40] sm:$0xff] }
   0x6   :  { %2357 = vmatmul.mubr.msk.bf16.vlgmr.msra.gmra.mxu0 %vm31_vm1, %v19_v4  ;;  %v155_v26 = vld [vmem:[%s3438_s2 + $0x88] sm:$0xff]  ;;  %v157_v27 = vld [vmem:[%s3438_s2 + $0x98] sm:$0xff]  ;;  %v148_v31 = vld [vmem:[%s3438_s2 + $0x50] sm:$0xff] }
   0x7   :  { %2363 = vmatpush3.bf16.msra.mxu1 %v2588_v6  ;;  %v150_v32 = vld [vmem:[%s3438_s2 + $0x60] sm:$0xff]  ;;  %v152_v37 = vld [vmem:[%s3438_s2 + $0x70] sm:$0xff]  ;;  %v186_v2 = vld [vmem:[%s3438_s2 + $0xb8] sm:$0xff] }
   0x8   :  { %v154_v38 = vld [vmem:[%s3438_s2 + $0x80] sm:$0xff]  ;;  %v156_v39 = vld [vmem:[%s3438_s2 + $0x90] sm:$0xff]  ;;  %v184_v4 = vld [vmem:[%s3438_s2 + $0xa8] sm:$0xff] }
   0x9   :  { %v158_v44 = vld [vmem:[%s3438_s2 + $0xa0] sm:$0xff] }
  0xc6   :  { %v69_v7 = vpop.f32.mrf.mxu0 }
  0xc7   :  { %v70_v11 = vadd.f32 %v2147_v8, %v69_v7  ;;  %v187_v7 = vld [vmem:[%s3438_s2 + $0xc0] sm:$0xff] }
  0xc8   :  { %v2358_v9 = vpop.f32.mrf.mxu0 }
  0xca   :  { %v72_v10 = vpop.f32.mrf.mxu0 }
  0xcb   :  { %v73_v12 = vadd.f32 %v2147_v8, %v72_v10 }
  0xcc   :  { %v2359_v13 = vpop.f32.mrf.mxu0 }
  0xcd   :  { %v80_v14 = vpack.c.bf16 %v73_v12, %v70_v11  ;;  %v185_v11 = vld [vmem:[%s3438_s2 + $0xb0] sm:$0xff] }
  0xcf   :  { %2365 = vmatmul.mubr.msk.bf16.vlgmr.msra.gmra.mxu1 %vm98_vm2, %v80_v14 }
 0x18f   :  { %v136_v16 = vpop.f32.mrf.mxu1 }
 0x190   :  { %v137_v17 = vadd.f32 %v2150_v15, %v136_v16 }
 0x191   :  { %v2366_v21 = vpop.f32.mrf.mxu1 }
 0x192   :  { %v159_v29 = vmul.f32 %v143_v18, %v137_v17  ;;  %v161_v34 = vmul.f32 %v145_v19, %v137_v17  ;;  %v163_v35 = vmul.f32 %v147_v20, %v137_v17  ;;  %v165_v36 = vmul.f32 %v149_v22, %v137_v17  ;;  %v188_v22 = vld [vmem:[%s3438_s2 + $0xc8] sm:$0xff] }
 0x193   :  { %v139_v28 = vpop.f32.mrf.mxu1  ;;  %v167_v41 = vmul.f32 %v151_v23, %v137_v17  ;;  %v169_v42 = vmul.f32 %v153_v24, %v137_v17  ;;  %v171_v43 = vmul.f32 %v155_v26, %v137_v17  ;;  %v173_v45 = vmul.f32 %v157_v27, %v137_v17 }
 0x194   :  { %v140_v33 = vadd.f32 %v2150_v15, %v139_v28  ;;  %v191_v28 = vld [vmem:[%s3438_s2 + $0xe0] sm:$0xff] }
 0x195   :  { %v2367_v40 = vpop.f32.mrf.mxu1 }
 0x196   :  { %v2819_v46 = vpack.c.bf16 %v140_v33, %v137_v17  ;;  %v160_v47 = vmul.f32 %v144_v25, %v140_v33  ;;  %v162_v48 = vmul.f32 %v146_v30, %v140_v33  ;;  %v164_v49 = vmul.f32 %v148_v31, %v140_v33  ;;  %v190_v17 = vld [vmem:[%s3438_s2 + $0xd8] sm:$0xff]  ;;  %v192_v40 = vld [vmem:[%s3438_s2 + $0xe8] sm:$0xff] }
 0x197   :  { %v166_v50 = vmul.f32 %v150_v32, %v140_v33  ;;  %v168_v51 = vmul.f32 %v152_v37, %v140_v33  ;;  %v170_v52 = vmul.f32 %v154_v38, %v140_v33  ;;  %v172_v53 = vmul.f32 %v156_v39, %v140_v33  ;;  %v194_v25 = vld [vmem:[%s3438_s2 + $0xf8] sm:$0xff] }
 0x198   :  { %201 = vrot.lane.b32.xlu0 %v2819_v46, %s2718_s29  ;;  %v175_v54 = vpack.c.bf16 %v160_v47, %v159_v29  ;;  %v176_v55 = vpack.c.bf16 %v162_v48, %v161_v34  ;;  %v177_v56 = vpack.c.bf16 %v164_v49, %v163_v35  ;;  %v174_v57 = vmul.f32 %v158_v44, %v140_v33  ;;  %v189_v35 = vld [vmem:[%s3438_s2 + $0xd0] sm:$0xff] }
 0x199   :  { %v178_v58 = vpack.c.bf16 %v166_v50, %v165_v36  ;;  %v179_v59 = vpack.c.bf16 %v168_v51, %v167_v41  ;;  %v180_v60 = vpack.c.bf16 %v170_v52, %v169_v42  ;;  %v181_v61 = vpack.c.bf16 %v172_v53, %v171_v43  ;;  %v196_v42 = vld [vmem:[%s3438_s2 + $0x108] sm:$0xff]  ;;  %v198_v43 = vld [vmem:[%s3438_s2 + $0x118] sm:$0xff]  ;;  %v193_v49 = vld [vmem:[%s3438_s2 + $0xf0] sm:$0xff] }
 0x19a   :  { %2370 = vmatprep.mubr.msk.bf16.mxu0 %vm98_vm2, %v175_v54  ;;  %v182_v62 = vpack.c.bf16 %v174_v57, %v173_v45  ;;  %v195_v54 = vld [vmem:[%s3438_s2 + $0x100] sm:$0xff] }
 0x20a   :  { %v202_v63 = vpop.permute.xlu0 %201 }
 0x20b   :  { %v228_v1 = vsel %vm98_vm2, %v202_v63, 0  ;;  %2580 = vmatprep.subr.msk.bf16.mxu0 %vm98_vm2, %v202_v63  ;;  %v199_v63 = vld [vmem:[%s3438_s2 + $0x120] sm:$0xff] }
 0x20c   :  { %2369 = vmatpush3.bf16.xpose.msra.mxu0 %v228_v1 }
 0x20d   :  { %2404 = vmatprep.subr.bf16.mxu0 %v2716_v0 }
 0x213   :  { %2371 = vmatmul.mubr.msk.bf16.vlgmr.msra.gmra.mxu0 %vm98_vm2, %v176_v55 }
 0x214   :  { %2374 = vmatprep.mubr.msk.bf16.mxu0 %vm98_vm2, %v177_v56 }
 0x21b   :  { %2375 = vmatmul.mubr.msk.bf16.gmra.mxu0 %vm98_vm2, %v178_v58 }
 0x21c   :  { %2378 = vmatprep.mubr.msk.bf16.mxu0 %vm98_vm2, %v179_v59 }
 0x223   :  { %2379 = vmatmul.mubr.msk.bf16.gmra.mxu0 %vm98_vm2, %v180_v60  ;;  %v197_v60 = vld [vmem:[%s3438_s2 + $0x110] sm:$0xff] }
 0x224   :  { %2382 = vmatprep.mubr.msk.bf16.mxu0 %vm98_vm2, %v181_v61 }
 0x22b   :  { %2383 = vmatmul.mubr.msk.bf16.gmra.mxu0 %vm98_vm2, %v182_v62 }
 0x22c   :  { %2408 = vmatprep.mubr.msk.bf16.mxu0 %vm2717_vm0, %v2716_v0 }
 0x2d3   :  { %v2372_v3 = vpop.f32.mrf.mxu0 }
 0x2d4   :  { %v2841_v5 = vadd.f32 %v2372_v3, %v186_v2 }
 0x2d5   :  { %v264_v6 = vpop.f32.mrf.mxu0 }
 0x2d6   :  { %v2846_v8 = vadd.f32 %v264_v6, %v184_v4  ;;  %v333_v9 = vsel %vm31_vm1, %v2841_v5, -inf }
 0x2d7   :  { %334 = vmax.xlane.f32.xlu1 %v333_v9  ;;  %v2373_v10 = vpop.f32.mrf.mxu0 }
 0x2d8   :  { %v2853_v12 = vadd.f32 %v2373_v10, %v187_v7  ;;  %v327_v13 = vsel %vm31_vm1, %v2846_v8, -inf }
 0x2d9   :  { %v267_v14 = vpop.f32.mrf.mxu0  ;;  %328 = vmax.xlane.f32.xlu0 %v327_v13 }
 0x2da   :  { %v2857_v15 = vadd.f32 %v267_v14, %v185_v11  ;;  %v336_v16 = vsel %vm31_vm1, %v2853_v12, -inf }
 0x2db   :  { %337 = vmax.xlane.f32.xlu1 %v336_v16  ;;  %v2376_v18 = vpop.f32.mrf.mxu0 }
 0x2dc   :  { %v2864_v20 = vadd.f32 %v2376_v18, %v190_v17  ;;  %v330_v21 = vsel %vm31_vm1, %v2857_v15, -inf }
 0x2dd   :  { %v280_v19 = vpop.f32.mrf.mxu0 }
 0x2de   :  { %v2874_v26 = vadd.f32 %v280_v19, %v188_v22  ;;  %v345_v27 = vsel %vm31_vm1, %v2864_v20, -inf }
 0x2df   :  { %v2377_v23 = vpop.f32.mrf.mxu0  ;;  %331 = vmax.xlane.f32.xlu1 %v330_v21 }
 0x2e0   :  { %v2883_v32 = vadd.f32 %v2377_v23, %v191_v28  ;;  %v339_v33 = vsel %vm31_vm1, %v2874_v26, -inf }
 0x2e1   :  { %v283_v24 = vpop.f32.mrf.mxu0 }
 0x2e2   :  { %v2892_v38 = vadd.f32 %v283_v24, %v189_v35  ;;  %v348_v39 = vsel %vm31_vm1, %v2883_v32, -inf }
 0x2e3   :  { %v2380_v29 = vpop.f32.mrf.mxu0  ;;  %346 = vmax.xlane.f32.xlu1 %v345_v27 }
 0x2e4   :  { %v2881_v30 = vadd.f32 %v2380_v29, %v194_v25  ;;  %v342_v48 = vsel %vm31_vm1, %v2892_v38, -inf }
 0x2e5   :  { %v296_v31 = vpop.f32.mrf.mxu0 }
 0x2e6   :  { %v357_v34 = vsel %vm31_vm1, %v2881_v30, -inf  ;;  %v2905_v45 = vadd.f32 %v296_v31, %v192_v40 }
 0x2e7   :  { %v2381_v36 = vpop.f32.mrf.mxu0  ;;  %340 = vmax.xlane.f32.xlu1 %v339_v33  ;;  %358 = vmax.xlane.f32.xlu0 %v357_v34 }
 0x2e8   :  { %v351_v53 = vsel %vm31_vm1, %v2905_v45, -inf  ;;  %v2927_v57 = vadd.f32 %v2381_v36, %v195_v54 }
 0x2e9   :  { %v299_v37 = vpop.f32.mrf.mxu0 }
 0x2ea   :  { %v2918_v52 = vadd.f32 %v299_v37, %v193_v49  ;;  %v360_v62 = vsel %vm31_vm1, %v2927_v57, -inf }
 0x2eb   :  { %v2384_v41 = vpop.f32.mrf.mxu0  ;;  %349 = vmax.xlane.f32.xlu1 %v348_v39 }
 0x2ec   :  { %v2914_v50 = vadd.f32 %v2384_v41, %v198_v43  ;;  %v354_v58 = vsel %vm31_vm1, %v2918_v52, -inf }
 0x2ed   :  { %v312_v44 = vpop.f32.mrf.mxu0 }
 0x2ee   :  { %v2907_v47 = vadd.f32 %v312_v44, %v196_v42  ;;  %v369_v56 = vsel %vm31_vm1, %v2914_v50, -inf }
 0x2ef   :  { %343 = vmax.xlane.f32.xlu1 %v342_v48  ;;  %v2385_v55 = vpop.f32.mrf.mxu0 }
 0x2f0   :  { %v363_v51 = vsel %vm31_vm1, %v2907_v47, -inf  ;;  %v2941_v1 = vadd.f32 %v2385_v55, %v199_v63 }
 0x2f1   :  { %364 = vmax.xlane.f32.xlu0 %v363_v51  ;;  %v315_v59 = vpop.f32.mrf.mxu0 }
 0x2f2   :  { %v2934_v61 = vadd.f32 %v315_v59, %v197_v60  ;;  %v372_v3 = vsel %vm31_vm1, %v2941_v1, -inf }
 0x2f3   :  { %352 = vmax.xlane.f32.xlu1 %v351_v53 }
 0x2f4   :  { %v366_v2 = vsel %vm31_vm1, %v2934_v61, -inf }
 0x2f5   :  { %370 = vmax.xlane.f32.xlu0 %v369_v56 }
 0x2f7   :  { %355 = vmax.xlane.f32.xlu1 %v354_v58 }
 0x2fb   :  { %361 = vmax.xlane.f32.xlu1 %v360_v62 }
 0x2ff   :  { %367 = vmax.xlane.f32.xlu1 %v366_v2 }
 0x303   :  { %373 = vmax.xlane.f32.xlu1 %v372_v3 }
 0x360   :  { %v335_v4 = vpop.xlane.xlu1 %334 }
 0x361   :  { %v377_v6 = vsub.f32 %v2841_v5, %v335_v4 }
 0x362   :  { %v329_v7 = vpop.xlane.xlu0 %328 }
 0x363   :  { %v395_v9 = vmul.f32 1.442695, %v377_v6  ;;  %v375_v10 = vsub.f32 %v2846_v8, %v329_v7 }
 0x364   :  { %v338_v11 = vpop.xlane.xlu1 %337 }
 0x365   :  { %2644 = vpow2.f32 %v395_v9  ;;  %v391_v13 = vmul.f32 1.442695, %v375_v10  ;;  %v378_v14 = vsub.f32 %v2853_v12, %v338_v11 }
 0x367   :  { %2646 = vpow2.f32 %v391_v13  ;;  %v397_v18 = vmul.f32 1.442695, %v378_v14 }
 0x368   :  { %v332_v16 = vpop.xlane.xlu1 %331 }
 0x369   :  { %v376_v17 = vsub.f32 %v2857_v15, %v332_v16 }
 0x36b   :  { %v393_v19 = vmul.f32 1.442695, %v376_v17 }
 0x36c   :  { %v347_v21 = vpop.xlane.xlu1 %346 }
 0x36d   :  { %2648 = vpow2.f32 %v393_v19  ;;  %v381_v22 = vsub.f32 %v2864_v20, %v347_v21 }
 0x36e   :  { %2650 = vpow2.f32 %v397_v18 }
 0x36f   :  { %v403_v5 = vmul.f32 1.442695, %v381_v22 }
 0x370   :  { %v341_v23 = vpop.xlane.xlu1 %340  ;;  %v359_v24 = vpop.xlane.xlu0 %358 }
 0x371   :  { %2652 = vpow2.f32 %v403_v5  ;;  %v379_v8 = vsub.f32 %v2874_v26, %v341_v23  ;;  %v385_v25 = vsub.f32 %v2881_v30, %v359_v24 }
 0x372   :  { %v2954_v12 = vpop.eup %2644 }
 0x373   :  { %v399_v27 = vmul.f32 1.442695, %v379_v8  ;;  %v411_v28 = vmul.f32 1.442695, %v385_v25  ;;  %v429_v15 = vsel %vm31_vm1, %v2954_v12, 0.0 }
 0x374   :  { %v2958_v29 = vpop.eup %2646  ;;  %v350_v31 = vpop.xlane.xlu1 %349  ;;  %430 = vadd.xlane.f32.xlu0 %v429_v15 }
 0x375   :  { %2654 = vpow2.f32 %v399_v27  ;;  %v382_v20 = vsub.f32 %v2883_v32, %v350_v31  ;;  %v423_v26 = vsel %vm31_vm1, %v2958_v29, 0.0 }
 0x376   :  { %2656 = vpow2.f32 %v411_v28 }
 0x377   :  { %v405_v35 = vmul.f32 1.442695, %v382_v20 }
 0x378   :  { %v344_v33 = vpop.xlane.xlu1 %343  ;;  %424 = vadd.xlane.f32.xlu0 %v423_v26 }
 0x379   :  { %v380_v30 = vsub.f32 %v2892_v38, %v344_v33 }
 0x37a   :  { %v2964_v34 = vpop.eup %2648  ;;  %v365_v36 = vpop.xlane.xlu0 %364 }
 0x37b   :  { %v2966_v37 = vpop.eup %2650  ;;  %v401_v39 = vmul.f32 1.442695, %v380_v30  ;;  %v426_v40 = vsel %vm31_vm1, %v2964_v34, 0.0  ;;  %v387_v44 = vsub.f32 %v2907_v47, %v365_v36 }
 0x37c   :  { %427 = vadd.xlane.f32.xlu1 %v426_v40  ;;  %v353_v32 = vpop.xlane.xlu1 %352  ;;  %v432_v38 = vsel %vm31_vm1, %v2966_v37, 0.0 }
 0x37d   :  { %2658 = vpow2.f32 %v401_v39  ;;  %v383_v41 = vsub.f32 %v2905_v45, %v353_v32  ;;  %v415_v56 = vmul.f32 1.442695, %v387_v44 }
 0x37e   :  { %v2971_v42 = vpop.eup %2652  ;;  %2660 = vpow2.f32 %v405_v35  ;;  %v371_v43 = vpop.xlane.xlu0 %370 }
 0x37f   :  { %v407_v48 = vmul.f32 1.442695, %v383_v41  ;;  %v389_v49 = vsub.f32 %v2914_v50, %v371_v43  ;;  %v441_v51 = vsel %vm31_vm1, %v2971_v42, 0.0 }
 0x380   :  { %433 = vadd.xlane.f32.xlu1 %v432_v38  ;;  %v356_v53 = vpop.xlane.xlu1 %355  ;;  %442 = vadd.xlane.f32.xlu0 %v441_v51 }
 0x381   :  { %2662 = vpow2.f32 %v407_v48  ;;  %v419_v45 = vmul.f32 1.442695, %v389_v49  ;;  %v384_v54 = vsub.f32 %v2918_v52, %v356_v53 }
 0x382   :  { %v2980_v55 = vpop.eup %2654 }
 0x383   :  { %2664 = vpow2.f32 %v419_v45  ;;  %v409_v58 = vmul.f32 1.442695, %v384_v54  ;;  %v435_v47 = vsel %vm31_vm1, %v2980_v55, 0.0  ;;  %v2984_v59 = vpop.eup %2656 }
 0x384   :  { %v362_v50 = vpop.xlane.xlu1 %361  ;;  %436 = vadd.xlane.f32.xlu0 %v435_v47  ;;  %v453_v52 = vsel %vm31_vm1, %v2984_v59, 0.0 }
 0x385   :  { %2666 = vpow2.f32 %v409_v58  ;;  %v386_v60 = vsub.f32 %v2927_v57, %v362_v50 }
 0x386   :  { %2668 = vpow2.f32 %v415_v56 }
 0x387   :  { %v413_v62 = vmul.f32 1.442695, %v386_v60 }
 0x388   :  { %v368_v63 = vpop.xlane.xlu1 %367  ;;  %454 = vadd.xlane.f32.xlu0 %v453_v52 }
 0x389   :  { %2670 = vpow2.f32 %v413_v62  ;;  %v388_v2 = vsub.f32 %v2934_v61, %v368_v63 }
 0x38a   :  { %v2990_v3 = vpop.eup %2658 }
 0x38b   :  { %v2992_v4 = vpop.eup %2660  ;;  %v417_v6 = vmul.f32 1.442695, %v388_v2  ;;  %v438_v7 = vsel %vm31_vm1, %v2990_v3, 0.0 }
 0x38c   :  { %439 = vadd.xlane.f32.xlu1 %v438_v7  ;;  %v374_v57 = vpop.xlane.xlu1 %373  ;;  %v444_v13 = vsel %vm31_vm1, %v2992_v4, 0.0 }
 0x38d   :  { %2672 = vpow2.f32 %v417_v6  ;;  %v390_v9 = vsub.f32 %v2941_v1, %v374_v57 }
 0x38e   :  { %v2997_v10 = vpop.eup %2662 }
 0x38f   :  { %v421_v11 = vmul.f32 1.442695, %v390_v9  ;;  %v447_v61 = vsel %vm31_vm1, %v2997_v10, 0.0 }
 0x390   :  { %v3003_v14 = vpop.eup %2664  ;;  %445 = vadd.xlane.f32.xlu1 %v444_v13  ;;  %448 = vadd.xlane.f32.xlu0 %v447_v61 }
 0x391   :  { %2674 = vpow2.f32 %v421_v11  ;;  %v465_v1 = vsel %vm31_vm1, %v3003_v14, 0.0 }
 0x392   :  { %v3005_v16 = vpop.eup %2666 }
 0x393   :  { %v450_v17 = vsel %vm31_vm1, %v3005_v16, 0.0  ;;  %v3011_v18 = vpop.eup %2668 }
 0x394   :  { %451 = vadd.xlane.f32.xlu1 %v450_v17  ;;  %466 = vadd.xlane.f32.xlu0 %v465_v1  ;;  %v459_v22 = vsel %vm31_vm1, %v3011_v18, 0.0 }
 0x396   :  { %v3013_v19 = vpop.eup %2670 }
 0x397   :  { %v456_v21 = vsel %vm31_vm1, %v3013_v19, 0.0 }
 0x398   :  { %457 = vadd.xlane.f32.xlu1 %v456_v21  ;;  %460 = vadd.xlane.f32.xlu0 %v459_v22 }
 0x39a   :  { %v3019_v5 = vpop.eup %2672 }
 0x39b   :  { %v462_v23 = vsel %vm31_vm1, %v3019_v5, 0.0 }
 0x39c   :  { %463 = vadd.xlane.f32.xlu1 %v462_v23 }
 0x39e   :  { %v3023_v24 = vpop.eup %2674 }
 0x39f   :  { %v468_v8 = vsel %vm31_vm1, %v3023_v24, 0.0 }
 0x3a0   :  { %469 = vadd.xlane.f32.xlu1 %v468_v8 }
 0x3ae   :  { %511 = vrot.lane.b32.xlu0 %v2819_v46, %s2719_s7 }
 0x3fd   :  { %v431_v25 = vpop.xlane.xlu0 %430 }
 0x401   :  { %v425_v27 = vpop.xlane.xlu0 %424 }
 0x402   :  { %2676 = vrcp.f32 %v425_v27 }
 0x405   :  { %v428_v28 = vpop.xlane.xlu1 %427 }
 0x406   :  { %2678 = vrcp.f32 %v428_v28  ;;  %v635_v28 = vld [vmem:[%s3438_s2 + $0x20] sm:$0xff] }
 0x409   :  { %v443_v15 = vpop.xlane.xlu0 %442  ;;  %v434_v26 = vpop.xlane.xlu1 %433 }
 0x40a   :  { %2680 = vrcp.f32 %v434_v26 }
 0x40b   :  { %2682 = vrcp.f32 %v431_v25 }
 0x40d   :  { %v437_v31 = vpop.xlane.xlu0 %436 }
 0x40f   :  { %v2677_v20 = vpop.eup %2676 }
 0x410   :  { %v487_v30 = vmul.f32 %v2677_v20, %v2958_v29 }
 0x411   :  { %v455_v36 = vpop.xlane.xlu0 %454 }
 0x413   :  { %v2679_v33 = vpop.eup %2678 }
 0x414   :  { %v488_v35 = vmul.f32 %v2679_v33, %v2964_v34 }
 0x415   :  { %v440_v39 = vpop.xlane.xlu1 %439 }
 0x416   :  { %2684 = vrcp.f32 %v440_v39  ;;  %v503_v46 = vpack.c.bf16 %v488_v35, %v487_v30 }
 0x417   :  { %2686 = vrcp.f32 %v437_v31  ;;  %v2681_v38 = vpop.eup %2680 }
 0x418   :  { %2388 = vmatprep.mubr.msk.bf16.mxu1 %vm31_vm1, %v503_v46  ;;  %v2683_v34 = vpop.eup %2682  ;;  %v490_v51 = vmul.f32 %v2681_v38, %v2966_v37  ;;  %v637_v46 = vcombine.high %v635_v28, %v635_v28 }
 0x419   :  { %v446_v40 = vpop.xlane.xlu1 %445  ;;  %v449_v32 = vpop.xlane.xlu0 %448  ;;  %v489_v56 = vmul.f32 %v2683_v34, %v2954_v12 }
 0x41a   :  { %2688 = vrcp.f32 %v446_v40 }
 0x41b   :  { %2690 = vrcp.f32 %v443_v15  ;;  %v504_v47 = vpack.c.bf16 %v490_v51, %v489_v56 }
 0x41d   :  { %v452_v41 = vpop.xlane.xlu1 %451  ;;  %v467_v43 = vpop.xlane.xlu0 %466 }
 0x41e   :  { %2692 = vrcp.f32 %v452_v41 }
 0x41f   :  { %2694 = vrcp.f32 %v449_v32 }
 0x421   :  { %v458_v29 = vpop.xlane.xlu1 %457  ;;  %v461_v44 = vpop.xlane.xlu0 %460 }
 0x422   :  { %2696 = vrcp.f32 %v458_v29 }
 0x423   :  { %v2685_v48 = vpop.eup %2684  ;;  %2698 = vrcp.f32 %v455_v36 }
 0x424   :  { %v2687_v49 = vpop.eup %2686  ;;  %v492_v54 = vmul.f32 %v2685_v48, %v2990_v3 }
 0x425   :  { %v464_v53 = vpop.xlane.xlu1 %463  ;;  %v512_v45 = vpop.permute.xlu0 %511  ;;  %v491_v58 = vmul.f32 %v2687_v49, %v2980_v55 }
 0x426   :  { %2700 = vrcp.f32 %v464_v53  ;;  %2386 = vmatprep.subr.bf16.mxu1 %v512_v45 }
 0x427   :  { %2702 = vrcp.f32 %v461_v44  ;;  %2387 = vmatpush3.bf16.msra.mxu1 %v512_v45  ;;  %v2689_v50 = vpop.eup %2688  ;;  %v505_v62 = vpack.c.bf16 %v492_v54, %v491_v58 }
 0x428   :  { %2412 = vmatprep.subr.bf16.mxu1 %v2716_v0  ;;  %v2691_v37 = vpop.eup %2690  ;;  %v494_v12 = vmul.f32 %v2689_v50, %v2992_v4 }
 0x429   :  { %v470_v60 = vpop.xlane.xlu1 %469  ;;  %v493_v55 = vmul.f32 %v2691_v37, %v2971_v42 }
 0x42a   :  { %2389 = vmatmul.mubr.msk.bf16.vlgmr.msra.gmra.mxu1 %vm31_vm1, %v504_v47  ;;  %2704 = vrcp.f32 %v470_v60 }
 0x42b   :  { %v2693_v52 = vpop.eup %2692  ;;  %2392 = vmatprep.mubr.msk.bf16.mxu1 %vm31_vm1, %v505_v62  ;;  %2706 = vrcp.f32 %v467_v43  ;;  %v506_v6 = vpack.c.bf16 %v494_v12, %v493_v55 }
 0x42c   :  { %v2695_v63 = vpop.eup %2694  ;;  %v496_v2 = vmul.f32 %v2693_v52, %v3005_v16 }
 0x42d   :  { %v495_v3 = vmul.f32 %v2695_v63, %v2997_v10 }
 0x42f   :  { %v2697_v7 = vpop.eup %2696  ;;  %v507_v57 = vpack.c.bf16 %v496_v2, %v495_v3 }
 0x430   :  { %v2699_v9 = vpop.eup %2698  ;;  %v498_v61 = vmul.f32 %v2697_v7, %v3013_v19 }
 0x431   :  { %v497_v16 = vmul.f32 %v2699_v9, %v2984_v59  ;;  %v2589_v59 = vld [vmem:[%s3436_s1 + $0x20] sm:$0xff]  }
 0x432   :  { %2393 = vmatmul.mubr.msk.bf16.gmra.mxu1 %vm31_vm1, %v506_v6  ;;  %2405 = vmatpush3.bf16.msra.mxu0 %v2589_v59 }
 0x433   :  { %v2701_v11 = vpop.eup %2700  ;;  %2396 = vmatprep.mubr.msk.bf16.mxu1 %vm31_vm1, %v507_v57  ;;  %v508_v17 = vpack.c.bf16 %v498_v61, %v497_v16  ;;  %2406 = vmatprep.subr.bf16.mxu0 %v2716_v0 }
 0x434   :  { %v2703_v13 = vpop.eup %2702  ;;  %v500_v4 = vmul.f32 %v2701_v11, %v3019_v5  ;;  %v641_v5 = vlaneseq }
 0x435   :  { %v499_v42 = vmul.f32 %v2703_v13, %v3011_v18  ;;  %v2591_v18 = vld [vmem:[%s3436_s1 + $0x18] sm:$0xff]  }
 0x436   :  { %2407 = vmatpush3.bf16.msra.mxu0 %v2591_v18  ;;  %v642_v25 = vshrl.u32 %v641_v5, 7 }
 0x437   :  { %v2705_v10 = vpop.eup %2704  ;;  %v509_v1 = vpack.c.bf16 %v500_v4, %v499_v42  ;;  %2420 = vmatprep.subr.bf16.mxu0 %v2716_v0 }
 0x438   :  { %v2707_v21 = vpop.eup %2706  ;;  %v502_v22 = vmul.f32 %v2705_v10, %v3023_v24  ;;  %v688_v36 = vsub.s32 0, %v642_v25 }
 0x439   :  { %v501_v23 = vmul.f32 %v2707_v21, %v3003_v14  ;;  %v2720_v14 = vmov 1966171168  }
 0x43a   :  { %2397 = vmatmul.mubr.msk.bf16.gmra.mxu1 %vm31_vm1, %v508_v17  ;;  %v639_v19 = vunpack.c.l.s4 %v2720_v14 }
 0x43b   :  { %2400 = vmatprep.mubr.msk.bf16.mxu1 %vm31_vm1, %v509_v1  ;;  %v510_v8 = vpack.c.bf16 %v502_v22, %v501_v23 }
 0x43c   :  { %v640_v24 = vunpack.c.0.s8 %v639_v19 }
 0x43e   :  { %v643_v27 = vsub.s32 %v640_v24, %v642_v25 }
 0x440   :  { %v644_v15 = vrot.slane %v635_v28, %v643_v27  ;;  %v651_v29 = vrot.slane %v637_v46, %v643_v27 }
 0x442   :  { %2401 = vmatmul.mubr.msk.bf16.gmra.mxu1 %vm31_vm1, %v510_v8  ;;  %v652_v20 = vcombine.high %v644_v15, %v644_v15  ;;  %v660_v33 = vrot.slane %v644_v15, %v643_v27  ;;  %v667_v49 = vrot.slane %v651_v29, %v643_v27  ;;  %v653_v56 = vcombine.high %v651_v29, %v651_v29 }
 0x443   :  { %2416 = vmatprep.mubr.msk.bf16.mxu1 %vm2717_vm0, %v2716_v0 }
 0x444   :  { %v674_v35 = vrot.slane %v652_v20, %v643_v27  ;;  %v682_v39 = vcombine.high %v660_v33, %v660_v33  ;;  %v689_v32 = vrot.slane %v660_v33, %v688_v36  ;;  %v705_v37 = vrot.slane %v667_v49, %v688_v36 }
 0x445   :  { %v681_v55 = vrot.slane %v653_v56, %v643_v27  ;;  %v683_v7 = vcombine.high %v667_v49, %v667_v49 }
 0x446   :  { %v693_v43 = vrot.slane %v674_v35, %v688_v36  ;;  %v697_v38 = vrot.slane %v682_v39, %v688_v36  ;;  %v684_v44 = vcombine.high %v674_v35, %v674_v35 }
 0x447   :  { %v709_v17 = vrot.slane %v681_v55, %v688_v36  ;;  %v685_v21 = vcombine.high %v681_v55, %v681_v55  ;;  %v713_v59 = vrot.slane %v683_v7, %v688_v36 }
 0x448   :  { %v701_v58 = vrot.slane %v684_v44, %v688_v36 }
 0x4ea   :  { %v2390_v31 = vpop.f32.mrf.mxu1 }
 0x4eb   :  { %v728_v53 = vmul.f32 %v2390_v31, %v693_v43  ;;  %v717_v31 = vrot.slane %v685_v21, %v688_v36 }
 0x4ec   :  { %v572_v26 = vpop.f32.mrf.mxu1 }
 0x4ed   :  { %v726_v48 = vmul.f32 %v689_v32, %v572_v26  ;;  %v743_v63 = vsel %vm98_vm2, %v728_v53, 0.0 }
 0x4ee   :  { %v2391_v30 = vpop.f32.mrf.mxu1 }
 0x4ef   :  { %v742_v50 = vsel %vm98_vm2, %v726_v48, 0.0  ;;  %v729_v60 = vmul.f32 %v2391_v30, %v693_v43 }
 0x4f0   :  { %v575_v40 = vpop.f32.mrf.mxu1  ;;  %v744_v3 = vadd.f32 %v743_v63, %v742_v50 }
 0x4f1   :  { %v727_v45 = vmul.f32 %v689_v32, %v575_v40  ;;  %v758_v57 = vsel %vm98_vm2, %v729_v60, 0.0 }
 0x4f2   :  { %v2394_v41 = vpop.f32.mrf.mxu1 }
 0x4f3   :  { %v757_v12 = vsel %vm98_vm2, %v727_v45, 0.0  ;;  %v732_v9 = vmul.f32 %v2394_v41, %v701_v58  ;;  %v2170_v45 = vld [vmem:[%s3438_s2 + $0x2] ss:$0 sm:$0xff] }
 0x4f4   :  { %v588_v34 = vpop.f32.mrf.mxu1  ;;  %v759_v61 = vadd.f32 %v758_v57, %v757_v12 }
 0x4f5   :  { %v730_v54 = vmul.f32 %v697_v38, %v588_v34  ;;  %v747_v22 = vsel %vm98_vm2, %v732_v9, 0.0 }
 0x4f6   :  { %v2395_v51 = vpop.f32.mrf.mxu1 }
 0x4f7   :  { %v745_v2 = vsel %vm98_vm2, %v730_v54, 0.0  ;;  %v733_v42 = vmul.f32 %v2395_v51, %v701_v58 }
 0x4f8   :  { %v591_v47 = vpop.f32.mrf.mxu1  ;;  %v746_v4 = vadd.f32 %v745_v2, %v744_v3 }
 0x4f9   :  { %v731_v62 = vmul.f32 %v697_v38, %v591_v47  ;;  %v762_v19 = vsel %vm98_vm2, %v733_v42, 0.0 }
 0x4fa   :  { %v2398_v52 = vpop.f32.mrf.mxu1  ;;  %v748_v18 = vadd.f32 %v747_v22, %v746_v4 }
 0x4fb   :  { %v760_v11 = vsel %vm98_vm2, %v731_v62, 0.0  ;;  %v736_v5 = vmul.f32 %v2398_v52, %v709_v17 }
 0x4fc   :  { %v604_v6 = vpop.f32.mrf.mxu1  ;;  %v761_v10 = vadd.f32 %v760_v11, %v759_v61  ;;  %v2592_v11 = vld [vmem:[%s3436_s1 + $0x40] sm:$0xff]  }
 0x4fd   :  { %v734_v13 = vmul.f32 %v705_v37, %v604_v6  ;;  %v751_v30 = vsel %vm98_vm2, %v736_v5, 0.0  ;;  %2413 = vmatpush3.bf16.msra.mxu1 %v2592_v11  ;;  %v2594_v61 = vld [vmem:[%s3436_s1 + $0x60] sm:$0xff]   ;;  %v2608_v11 = vld [vmem:[%s3436_s1 + $0xd0] sm:$0xff]  }
 0x4fe   :  { %v2399_v16 = vpop.f32.mrf.mxu1  ;;  %v763_v27 = vadd.f32 %v762_v19, %v761_v10  ;;  %2414 = vmatprep.subr.bf16.mxu1 %v2716_v0 }
 0x4ff   :  { %v749_v23 = vsel %vm98_vm2, %v734_v13, 0.0  ;;  %v737_v15 = vmul.f32 %v2399_v16, %v709_v17  ;;  %v2593_v13 = vld [vmem:[%s3436_s1 + $0x38] sm:$0xff]  }
 0x500   :  { %v607_v1 = vpop.f32.mrf.mxu1  ;;  %v750_v25 = vadd.f32 %v749_v23, %v748_v18  ;;  %v2174_v23 = vld [vmem:[%s3438_s2 + $0x3] ss:$0 sm:$0xff] }
 0x501   :  { %v735_v8 = vmul.f32 %v705_v37, %v607_v1  ;;  %v766_v40 = vsel %vm98_vm2, %v737_v15, 0.0  ;;  %2415 = vmatpush3.bf16.msra.mxu1 %v2593_v13  ;;  %v2597_v15 = vld [vmem:[%s3436_s1 + $0x48] sm:$0xff]  }
 0x502   :  { %v2402_v14 = vpop.f32.mrf.mxu1  ;;  %v752_v39 = vadd.f32 %v751_v30, %v750_v25  ;;  %2432 = vmatprep.subr.bf16.mxu1 %v2716_v0  ;;  %v2192_v13 = vld [vmem:[%s3438_s2 + $0x9] ss:$0 sm:$0xff] }
 0x503   :  { %v764_v24 = vsel %vm98_vm2, %v735_v8, 0.0  ;;  %v740_v32 = vmul.f32 %v2402_v14, %v717_v31  ;;  %v2175_v14 = vld [vmem:[%s3438_s2 + $0x4] ss:$0 sm:$0xff] }
 0x504   :  { %v620_v28 = vpop.f32.mrf.mxu1  ;;  %v765_v26 = vadd.f32 %v764_v24, %v763_v27  ;;  %v2595_v27 = vld [vmem:[%s3436_s1 + $0x58] sm:$0xff]  }
 0x505   :  { %v738_v20 = vmul.f32 %v713_v59, %v620_v28  ;;  %v755_v36 = vsel %vm98_vm2, %v740_v32, 0.0  ;;  %v2596_v28 = vld [vmem:[%s3436_s1 + $0x50] sm:$0xff]  }
 0x506   :  { %v2403_v33 = vpop.f32.mrf.mxu1  ;;  %v767_v29 = vadd.f32 %v766_v40, %v765_v26 }
 0x507   :  { %v753_v35 = vsel %vm98_vm2, %v738_v20, 0.0  ;;  %v741_v41 = vmul.f32 %v2403_v33, %v717_v31  ;;  %v2598_v31 = vld [vmem:[%s3436_s1 + $0x80] sm:$0xff]   ;;  %v2176_v20 = vld [vmem:[%s3438_s2 + $0x8] ss:$0 sm:$0xff] }
 0x508   :  { %v623_v46 = vpop.f32.mrf.mxu1  ;;  %v754_v38 = vadd.f32 %v753_v35, %v752_v39 }
 0x509   :  { %v739_v43 = vmul.f32 %v713_v59, %v623_v46  ;;  %v770_v48 = vsel %vm98_vm2, %v741_v41, 0.0 }
 0x50a   :  { %v756_v49 = vadd.f32 %v755_v36, %v754_v38  ;;  %v2600_v38 = vld [vmem:[%s3436_s1 + $0x70] sm:$0xff]  }
 0x50b   :  { %v768_v44 = vsel %vm98_vm2, %v739_v43, 0.0  ;;  %v2599_v43 = vld [vmem:[%s3436_s1 + $0x78] sm:$0xff]  }
 0x50c   :  { %v769_v34 = vadd.f32 %v768_v44, %v767_v29  ;;  %v2601_v29 = vld [vmem:[%s3436_s1 + $0x68] sm:$0xff]   ;;  %v2180_v44 = vld [vmem:[%s3438_s2 + $0x10] ss:$0 sm:$0xff] }
 0x50e   :  { %v771_v51 = vadd.f32 %v770_v48, %v769_v34 }
 0x510   :  { %v776_v53 = vpack.c.bf16 %v771_v51, %v756_v49 }
 0x512   :  { %2409 = vmatmul.mubr.msk.bf16.vlgmr.msra.gmra.mxu0 %vm98_vm2, %v776_v53 }
 0x513   :  { %2428 = vmatprep.mubr.msk.bf16.mxu0 %vm2717_vm0, %v2716_v0  ;;  %2421 = vmatpush3.bf16.msra.mxu0 %v2594_v61 }
 0x514   :  { %2422 = vmatprep.subr.bf16.mxu0 %v2716_v0 }
 0x517   :  { %2423 = vmatpush3.bf16.msra.mxu0 %v2595_v27 }
 0x518   :  { %2424 = vmatprep.subr.bf16.mxu0 %v2716_v0 }
 0x51b   :  { %2425 = vmatpush3.bf16.msra.mxu0 %v2596_v28 }
 0x51c   :  { %2426 = vmatprep.subr.bf16.mxu0 %v2716_v0 }
 0x51f   :  { %2427 = vmatpush3.bf16.msra.mxu0 %v2597_v15 }
 0x520   :  { %2444 = vmatprep.subr.bf16.mxu0 %v2716_v0 }
 0x5d2   :  { %v831_v54 = vpop.f32.mrf.mxu0 }
 0x5d3   :  { %v832_v56 = vadd.f32 %v2170_v45, %v831_v54 }
 0x5d4   :  { %v2410_v58 = vpop.f32.mrf.mxu0 }
 0x5d5   :  { %v838_v47 = vsel %vm98_vm2, %v832_v56, 0.0  ;;  %v2602_v58 = vld [vmem:[%s3436_s1 + $0x90] sm:$0xff]  }
 0x5d6   :  { %839 = vadd.xlane.f32.xlu1 %v838_v47  ;;  %v834_v50 = vpop.f32.mrf.mxu0  ;;  %v2603_v47 = vld [vmem:[%s3436_s1 + $0x88] sm:$0xff]  }
 0x5d7   :  { %v835_v60 = vadd.f32 %v2170_v45, %v834_v50  ;;  %v2604_v50 = vld [vmem:[%s3436_s1 + $0xb0] sm:$0xff]  }
 0x5d8   :  { %v2411_v62 = vpop.f32.mrf.mxu0 }
 0x5d9   :  { %v841_v37 = vsel %vm98_vm2, %v835_v60, 0.0 }
 0x5da   :  { %842 = vadd.xlane.f32.xlu1 %v841_v37 }
 0x65f   :  { %v840_v52 = vpop.xlane.xlu1 %839 }
 0x660   :  { %v845_v63 = vmul.f32 0.03125, %v840_v52 }
 0x662   :  { %v847_v12 = vsub.f32 %v832_v56, %v845_v63 }
 0x663   :  { %v843_v2 = vpop.xlane.xlu1 %842 }
 0x664   :  { %v846_v55 = vmul.f32 0.03125, %v843_v2  ;;  %v849_v3 = vmul.f32 %v847_v12, %v847_v12 }
 0x666   :  { %v848_v6 = vsub.f32 %v835_v60, %v846_v55  ;;  %v851_v7 = vsel %vm98_vm2, %v849_v3, 0.0  ;;  %v2186_v60 = vld [vmem:[%s3438_s2 + $0x18] ss:$0 sm:$0xff] }
 0x667   :  { %852 = vadd.xlane.f32.xlu1 %v851_v7  ;;  %v2605_v7 = vld [vmem:[%s3436_s1 + $0xa8] sm:$0xff]  }
 0x668   :  { %v850_v57 = vmul.f32 %v848_v6, %v848_v6 }
 0x66a   :  { %v854_v9 = vsel %vm98_vm2, %v850_v57, 0.0  ;;  %v2606_v57 = vld [vmem:[%s3436_s1 + $0xa0] sm:$0xff]  }
 0x66b   :  { %855 = vadd.xlane.f32.xlu1 %v854_v9  ;;  %v2607_v9 = vld [vmem:[%s3436_s1 + $0x98] sm:$0xff]  }
 0x6f0   :  { %v853_v4 = vpop.xlane.xlu1 %852 }
 0x6f1   :  { %v857_v16 = vmul.f32 0.03125, %v853_v4 }
 0x6f3   :  { %v859_v42 = vadd.f32 1e-05, %v857_v16 }
 0x6f4   :  { %v856_v17 = vpop.xlane.xlu1 %855 }
 0x6f5   :  { %2708 = vrsqrt.f32 %v859_v42  ;;  %v858_v10 = vmul.f32 0.03125, %v856_v17 }
 0x6f7   :  { %v860_v1 = vadd.f32 1e-05, %v858_v10 }
 0x6f9   :  { %2710 = vrsqrt.f32 %v860_v1 }
 0x702   :  { %v2709_v21 = vpop.eup %2708 }
 0x703   :  { %v863_v22 = vmul.f32 %v2709_v21, %v847_v12 }
 0x705   :  { %v870_v59 = vmul.f32 %v2174_v23, %v863_v22 }
 0x706   :  { %v2711_v8 = vpop.eup %2710 }
 0x707   :  { %v864_v18 = vmul.f32 %v2711_v8, %v848_v6  ;;  %v3110_v5 = vadd.f32 %v2175_v14, %v870_v59  ;;  %v2610_v8 = vld [vmem:[%s3436_s1 + $0xc0] sm:$0xff]   ;;  %v2611_v59 = vld [vmem:[%s3436_s1 + $0xb8] sm:$0xff]  }
 0x709   :  { %v871_v19 = vmul.f32 %v2174_v23, %v864_v18  ;;  %v2609_v23 = vld [vmem:[%s3436_s1 + $0xc8] sm:$0xff]   ;;  %v2196_v18 = vld [vmem:[%s3438_s2 + $0x11] ss:$0 sm:$0xff] }
 0x70b   :  { %v3112_v24 = vadd.f32 %v2175_v14, %v871_v19 }
 0x70d   :  { %v899_v25 = vpack.c.bf16 %v3112_v24, %v3110_v5 }
 0x70f   :  { %2417 = vmatmul.mubr.msk.bf16.vlgmr.msra.gmra.mxu1 %vm98_vm2, %v899_v25 }
 0x710   :  { %2440 = vmatprep.mubr.msk.bf16.mxu1 %vm2717_vm0, %v2716_v0  ;;  %2433 = vmatpush3.bf16.msra.mxu1 %v2598_v31 }
 0x711   :  { %2434 = vmatprep.subr.bf16.mxu1 %v2716_v0 }
 0x714   :  { %2435 = vmatpush3.bf16.msra.mxu1 %v2599_v43 }
 0x715   :  { %2436 = vmatprep.subr.bf16.mxu1 %v2716_v0 }
 0x718   :  { %2437 = vmatpush3.bf16.msra.mxu1 %v2600_v38 }
 0x719   :  { %2438 = vmatprep.subr.bf16.mxu1 %v2716_v0 }
 0x71c   :  { %2439 = vmatpush3.bf16.msra.mxu1 %v2601_v29 }
 0x71d   :  { %2452 = vmatprep.subr.bf16.mxu1 %v2716_v0 }
 0x7cf   :  { %v954_v26 = vpop.f32.mrf.mxu1 }
 0x7d0   :  { %v955_v30 = vadd.f32 %v2176_v20, %v954_v26  ;;  %v2613_v26 = vld [vmem:[%s3436_s1 + $0xd8] sm:$0xff]  }
 0x7d1   :  { %v2418_v33 = vpop.f32.mrf.mxu1 }
 0x7d2   :  { %v961_v40 = vmax.f32 %v955_v30, 0.0  ;;  %v2614_v33 = vld [vmem:[%s3436_s1 + $0x100] sm:$0xff]   ;;  %v2202_v30 = vld [vmem:[%s3438_s2 + $0x19] ss:$0 sm:$0xff] }
 0x7d3   :  { %v957_v35 = vpop.f32.mrf.mxu1 }
 0x7d4   :  { %v958_v39 = vadd.f32 %v2176_v20, %v957_v35  ;;  %v2612_v20 = vld [vmem:[%s3436_s1 + $0xe0] sm:$0xff]  }
 0x7d5   :  { %v2419_v46 = vpop.f32.mrf.mxu1 }
 0x7d6   :  { %v962_v32 = vmax.f32 %v958_v39, 0.0 }
 0x7d8   :  { %v963_v41 = vpack.c.bf16 %v962_v32, %v961_v40 }
 0x7da   :  { %2429 = vmatmul.mubr.msk.bf16.vlgmr.msra.gmra.mxu0 %vm993_vm3, %v963_v41 }
 0x7db   :  { %2448 = vmatprep.mubr.msk.bf16.mxu0 %vm2717_vm0, %v2716_v0  ;;  %2445 = vmatpush3.bf16.msra.mxu0 %v2602_v58 }
 0x7dc   :  { %2446 = vmatprep.subr.bf16.mxu0 %v2716_v0 }
 0x7df   :  { %2447 = vmatpush3.bf16.msra.mxu0 %v2603_v47 }
 0x7e0   :  { %2464 = vmatprep.subr.bf16.mxu0 %v2716_v0 }
 0x89a   :  { %v1031_v34 = vpop.f32.mrf.mxu0 }
 0x89b   :  { %v1032_v48 = vadd.f32 %v2180_v44, %v1031_v34  ;;  %v2616_v34 = vld [vmem:[%s3436_s1 + $0xf0] sm:$0xff]  }
 0x89c   :  { %v2430_v36 = vpop.f32.mrf.mxu0 }
 0x89d   :  { %v1038_v45 = vmax.f32 %v1032_v48, 0.0  ;;  %v2617_v36 = vld [vmem:[%s3436_s1 + $0xe8] sm:$0xff]   ;;  %v2618_v48 = vld [vmem:[%s3436_s1 + $0x120] sm:$0xff]  }
 0x89e   :  { %v1034_v49 = vpop.f32.mrf.mxu0 }
 0x89f   :  { %v1035_v51 = vadd.f32 %v2180_v44, %v1034_v49  ;;  %v2615_v44 = vld [vmem:[%s3436_s1 + $0xf8] sm:$0xff]   ;;  %v2208_v49 = vld [vmem:[%s3438_s2 + $0xa] ss:$0 sm:$0xff] }
 0x8a0   :  { %v2431_v53 = vpop.f32.mrf.mxu0 }
 0x8a1   :  { %v1039_v54 = vmax.f32 %v1035_v51, 0.0 }
 0x8a3   :  { %v1040_v56 = vpack.c.bf16 %v1039_v54, %v1038_v45 }
 0x8a5   :  { %2441 = vmatmul.mubr.msk.bf16.vlgmr.msra.gmra.mxu1 %vm993_vm3, %v1040_v56 }
 0x8a6   :  { %2460 = vmatprep.mubr.msk.bf16.mxu1 %vm2717_vm0, %v2716_v0  ;;  %2453 = vmatpush3.bf16.msra.mxu1 %v2604_v50 }
 0x8a7   :  { %2454 = vmatprep.subr.bf16.mxu1 %v2716_v0 }
 0x8aa   :  { %2455 = vmatpush3.bf16.msra.mxu1 %v2605_v7 }
 0x8ab   :  { %2456 = vmatprep.subr.bf16.mxu1 %v2716_v0 }
 0x8ae   :  { %2457 = vmatpush3.bf16.msra.mxu1 %v2606_v57 }
 0x8af   :  { %2458 = vmatprep.subr.bf16.mxu1 %v2716_v0 }
 0x8b2   :  { %2459 = vmatpush3.bf16.msra.mxu1 %v2607_v9 }
 0x8b3   :  { %2476 = vmatprep.subr.bf16.mxu1 %v2716_v0 }
 0x965   :  { %v1107_v62 = vpop.f32.mrf.mxu1 }
 0x966   :  { %v1108_v52 = vadd.f32 %v2186_v60, %v1107_v62  ;;  %v2619_v62 = vld [vmem:[%s3436_s1 + $0x118] sm:$0xff]  }
 0x967   :  { %v2442_v37 = vpop.f32.mrf.mxu1 }
 0x968   :  { %v3175_v55 = vadd.f32 %v1108_v52, %v3110_v5  ;;  %v2620_v37 = vld [vmem:[%s3436_s1 + $0x110] sm:$0xff]   ;;  %v2621_v52 = vld [vmem:[%s3436_s1 + $0x108] sm:$0xff]  }
 0x969   :  { %v1110_v63 = vpop.f32.mrf.mxu1 }
 0x96a   :  { %v1111_v12 = vadd.f32 %v2186_v60, %v1110_v63  ;;  %v2212_v63 = vld [vmem:[%s3438_s2 + $0x12] ss:$0 sm:$0xff] }
 0x96b   :  { %v2443_v2 = vpop.f32.mrf.mxu1 }
 0x96c   :  { %v3178_v3 = vadd.f32 %v1111_v12, %v3112_v24 }
 0x96e   :  { %v1136_v6 = vpack.c.bf16 %v3178_v3, %v3175_v55 }
 0x970   :  { %2449 = vmatmul.mubr.msk.bf16.vlgmr.msra.gmra.mxu0 %vm98_vm2, %v1136_v6 }
 0x971   :  { %2472 = vmatprep.mubr.msk.bf16.mxu0 %vm2717_vm0, %v2716_v0  ;;  %2465 = vmatpush3.bf16.msra.mxu0 %v2608_v11 }
 0x972   :  { %2466 = vmatprep.subr.bf16.mxu0 %v2716_v0 }
 0x975   :  { %2467 = vmatpush3.bf16.msra.mxu0 %v2609_v23 }
 0x976   :  { %2468 = vmatprep.subr.bf16.mxu0 %v2716_v0 }
 0x979   :  { %2469 = vmatpush3.bf16.msra.mxu0 %v2610_v8 }
 0x97a   :  { %2470 = vmatprep.subr.bf16.mxu0 %v2716_v0 }
 0x97d   :  { %2471 = vmatpush3.bf16.msra.mxu0 %v2611_v59 }
 0x97e   :  { %2484 = vmatprep.subr.bf16.mxu0 %v2716_v0 }
 0xa30   :  { %v1191_v61 = vpop.f32.mrf.mxu0 }
 0xa31   :  { %v1192_v16 = vadd.f32 %v2192_v13, %v1191_v61  ;;  %v2623_v61 = vld [vmem:[%s3436_s1 + $0x128] sm:$0xff]  }
 0xa32   :  { %v2450_v4 = vpop.f32.mrf.mxu0 }
 0xa33   :  { %v1198_v1 = vmax.f32 %v1192_v16, 0.0  ;;  %v2624_v4 = vld [vmem:[%s3436_s1 + $0x150] sm:$0xff]   ;;  %v2218_v16 = vld [vmem:[%s3438_s2 + $0x1a] ss:$0 sm:$0xff] }
 0xa34   :  { %v1194_v42 = vpop.f32.mrf.mxu0 }
 0xa35   :  { %v1195_v17 = vadd.f32 %v2192_v13, %v1194_v42  ;;  %v2622_v13 = vld [vmem:[%s3436_s1 + $0x130] sm:$0xff]  }
 0xa36   :  { %v2451_v10 = vpop.f32.mrf.mxu0 }
 0xa37   :  { %v1199_v21 = vmax.f32 %v1195_v17, 0.0 }
 0xa39   :  { %v1200_v22 = vpack.c.bf16 %v1199_v21, %v1198_v1 }
 0xa3b   :  { %2461 = vmatmul.mubr.msk.bf16.vlgmr.msra.gmra.mxu1 %vm993_vm3, %v1200_v22 }
 0xa3c   :  { %2480 = vmatprep.mubr.msk.bf16.mxu1 %vm2717_vm0, %v2716_v0  ;;  %2477 = vmatpush3.bf16.msra.mxu1 %v2612_v20 }
 0xa3d   :  { %2478 = vmatprep.subr.bf16.mxu1 %v2716_v0 }
 0xa40   :  { %2479 = vmatpush3.bf16.msra.mxu1 %v2613_v26 }
 0xa41   :  { %2496 = vmatprep.subr.bf16.mxu1 %v2716_v0 }
 0xafb   :  { %v1267_v14 = vpop.f32.mrf.mxu1 }
 0xafc   :  { %v1268_v5 = vadd.f32 %v2196_v18, %v1267_v14  ;;  %v2626_v14 = vld [vmem:[%s3436_s1 + $0x140] sm:$0xff]  }
 0xafd   :  { %v2462_v19 = vpop.f32.mrf.mxu1 }
 0xafe   :  { %v1274_v28 = vmax.f32 %v1268_v5, 0.0  ;;  %v2627_v19 = vld [vmem:[%s3436_s1 + $0x138] sm:$0xff]   ;;  %v2628_v5 = vld [vmem:[%s3436_s1 + $0x170] sm:$0xff]  }
 0xaff   :  { %v1270_v24 = vpop.f32.mrf.mxu1 }
 0xb00   :  { %v1271_v25 = vadd.f32 %v2196_v18, %v1270_v24  ;;  %v2625_v18 = vld [vmem:[%s3436_s1 + $0x148] sm:$0xff]  }
 0xb01   :  { %v2463_v27 = vpop.f32.mrf.mxu1  ;;  %v2224_v24 = vld [vmem:[%s3438_s2 + $0xb] ss:$0 sm:$0xff] }
 0xb02   :  { %v1275_v15 = vmax.f32 %v1271_v25, 0.0 }
 0xb04   :  { %v1276_v31 = vpack.c.bf16 %v1275_v15, %v1274_v28 }
 0xb06   :  { %2473 = vmatmul.mubr.msk.bf16.vlgmr.msra.gmra.mxu0 %vm993_vm3, %v1276_v31 }
 0xb07   :  { %2492 = vmatprep.mubr.msk.bf16.mxu0 %vm2717_vm0, %v2716_v0  ;;  %2485 = vmatpush3.bf16.msra.mxu0 %v2614_v33 }
 0xb08   :  { %2486 = vmatprep.subr.bf16.mxu0 %v2716_v0 }
 0xb0b   :  { %2487 = vmatpush3.bf16.msra.mxu0 %v2615_v44 }
 0xb0c   :  { %2488 = vmatprep.subr.bf16.mxu0 %v2716_v0 }
 0xb0f   :  { %2489 = vmatpush3.bf16.msra.mxu0 %v2616_v34 }
 0xb10   :  { %2490 = vmatprep.subr.bf16.mxu0 %v2716_v0 }
 0xb13   :  { %2491 = vmatpush3.bf16.msra.mxu0 %v2617_v36 }
 0xb14   :  { %2508 = vmatprep.subr.bf16.mxu0 %v2716_v0 }
 0xbc6   :  { %v1343_v35 = vpop.f32.mrf.mxu0 }
 0xbc7   :  { %v1344_v46 = vadd.f32 %v2202_v30, %v1343_v35  ;;  %v2629_v35 = vld [vmem:[%s3436_s1 + $0x168] sm:$0xff]  }
 0xbc8   :  { %v2474_v39 = vpop.f32.mrf.mxu0 }
 0xbc9   :  { %v3241_v43 = vadd.f32 %v1344_v46, %v3175_v55  ;;  %v2630_v39 = vld [vmem:[%s3436_s1 + $0x160] sm:$0xff]   ;;  %v2631_v46 = vld [vmem:[%s3436_s1 + $0x158] sm:$0xff]  }
 0xbca   :  { %v1346_v40 = vpop.f32.mrf.mxu0 }
 0xbcb   :  { %v1347_v32 = vadd.f32 %v2202_v30, %v1346_v40  ;;  %v2228_v40 = vld [vmem:[%s3438_s2 + $0x13] ss:$0 sm:$0xff] }
 0xbcc   :  { %v2475_v41 = vpop.f32.mrf.mxu0 }
 0xbcd   :  { %v3244_v38 = vadd.f32 %v1347_v32, %v3178_v3 }
 0xbcf   :  { %v1372_v29 = vpack.c.bf16 %v3244_v38, %v3241_v43 }
 0xbd1   :  { %2481 = vmatmul.mubr.msk.bf16.vlgmr.msra.gmra.mxu1 %vm98_vm2, %v1372_v29 }
 0xbd2   :  { %2504 = vmatprep.mubr.msk.bf16.mxu1 %vm2717_vm0, %v2716_v0  ;;  %2497 = vmatpush3.bf16.msra.mxu1 %v2618_v48 }
 0xbd3   :  { %2498 = vmatprep.subr.bf16.mxu1 %v2716_v0 }
 0xbd6   :  { %2499 = vmatpush3.bf16.msra.mxu1 %v2619_v62 }
 0xbd7   :  { %2500 = vmatprep.subr.bf16.mxu1 %v2716_v0 }
 0xbda   :  { %2501 = vmatpush3.bf16.msra.mxu1 %v2620_v37 }
 0xbdb   :  { %2502 = vmatprep.subr.bf16.mxu1 %v2716_v0 }
 0xbde   :  { %2503 = vmatpush3.bf16.msra.mxu1 %v2621_v52 }
 0xbdf   :  { %2516 = vmatprep.subr.bf16.mxu1 %v2716_v0 }
 0xc91   :  { %v1427_v51 = vpop.f32.mrf.mxu1 }
 0xc92   :  { %v1428_v45 = vadd.f32 %v2208_v49, %v1427_v51  ;;  %v2633_v51 = vld [vmem:[%s3436_s1 + $0x178] sm:$0xff]  }
 0xc93   :  { %v2482_v53 = vpop.f32.mrf.mxu1 }
 0xc94   :  { %v1434_v47 = vmax.f32 %v1428_v45, 0.0  ;;  %v2634_v53 = vld [vmem:[%s3436_s1 + $0x1a0] sm:$0xff]   ;;  %v2234_v45 = vld [vmem:[%s3438_s2 + $0x1b] ss:$0 sm:$0xff] }
 0xc95   :  { %v1430_v54 = vpop.f32.mrf.mxu1 }
 0xc96   :  { %v1431_v56 = vadd.f32 %v2208_v49, %v1430_v54  ;;  %v2632_v49 = vld [vmem:[%s3436_s1 + $0x180] sm:$0xff]  }
 0xc97   :  { %v2483_v58 = vpop.f32.mrf.mxu1 }
 0xc98   :  { %v1435_v50 = vmax.f32 %v1431_v56, 0.0 }
 0xc9a   :  { %v1436_v60 = vpack.c.bf16 %v1435_v50, %v1434_v47 }
 0xc9c   :  { %2493 = vmatmul.mubr.msk.bf16.vlgmr.msra.gmra.mxu0 %vm993_vm3, %v1436_v60 }
 0xc9d   :  { %2512 = vmatprep.mubr.msk.bf16.mxu0 %vm2717_vm0, %v2716_v0  ;;  %2509 = vmatpush3.bf16.msra.mxu0 %v2622_v13 }
 0xc9e   :  { %2510 = vmatprep.subr.bf16.mxu0 %v2716_v0 }
 0xca1   :  { %2511 = vmatpush3.bf16.msra.mxu0 %v2623_v61 }
 0xca2   :  { %2528 = vmatprep.subr.bf16.mxu0 %v2716_v0 }
 0xd5c   :  { %v1503_v12 = vpop.f32.mrf.mxu0 }
 0xd5d   :  { %v1504_v55 = vadd.f32 %v2212_v63, %v1503_v12  ;;  %v2636_v12 = vld [vmem:[%s3436_s1 + $0x190] sm:$0xff]  }
 0xd5e   :  { %v2494_v2 = vpop.f32.mrf.mxu0 }
 0xd5f   :  { %v1510_v57 = vmax.f32 %v1504_v55, 0.0  ;;  %v2637_v2 = vld [vmem:[%s3436_s1 + $0x188] sm:$0xff]   ;;  %v2638_v55 = vld [vmem:[%s3436_s1 + $0x1c0] sm:$0xff]  }
 0xd60   :  { %v1506_v3 = vpop.f32.mrf.mxu0 }
 0xd61   :  { %v1507_v6 = vadd.f32 %v2212_v63, %v1506_v3  ;;  %v2635_v63 = vld [vmem:[%s3436_s1 + $0x198] sm:$0xff]   ;;  %v2240_v3 = vld [vmem:[%s3438_s2 + $0xc] ss:$0 sm:$0xff] }
 0xd62   :  { %v2495_v7 = vpop.f32.mrf.mxu0 }
 0xd63   :  { %v1511_v9 = vmax.f32 %v1507_v6, 0.0 }
 0xd65   :  { %v1512_v11 = vpack.c.bf16 %v1511_v9, %v1510_v57 }
 0xd67   :  { %2505 = vmatmul.mubr.msk.bf16.vlgmr.msra.gmra.mxu1 %vm993_vm3, %v1512_v11 }
 0xd68   :  { %2524 = vmatprep.mubr.msk.bf16.mxu1 %vm2717_vm0, %v2716_v0  ;;  %2517 = vmatpush3.bf16.msra.mxu1 %v2624_v4 }
 0xd69   :  { %2518 = vmatprep.subr.bf16.mxu1 %v2716_v0 }
 0xd6c   :  { %2519 = vmatpush3.bf16.msra.mxu1 %v2625_v18 }
 0xd6d   :  { %2520 = vmatprep.subr.bf16.mxu1 %v2716_v0 }
 0xd70   :  { %2521 = vmatpush3.bf16.msra.mxu1 %v2626_v14 }
 0xd71   :  { %2522 = vmatprep.subr.bf16.mxu1 %v2716_v0 }
 0xd74   :  { %2523 = vmatpush3.bf16.msra.mxu1 %v2627_v19 }
 0xd75   :  { %2540 = vmatprep.subr.bf16.mxu1 %v2716_v0 }
 0xe27   :  { %v1579_v42 = vpop.f32.mrf.mxu1 }
 0xe28   :  { %v1580_v10 = vadd.f32 %v2218_v16, %v1579_v42  ;;  %v2639_v42 = vld [vmem:[%s3436_s1 + $0x1b8] sm:$0xff]  }
 0xe29   :  { %v2506_v17 = vpop.f32.mrf.mxu1 }
 0xe2a   :  { %v3307_v23 = vadd.f32 %v1580_v10, %v3241_v43  ;;  %v2640_v17 = vld [vmem:[%s3436_s1 + $0x1b0] sm:$0xff]   ;;  %v2641_v10 = vld [vmem:[%s3436_s1 + $0x1a8] sm:$0xff]  }
 0xe2b   :  { %v1582_v1 = vpop.f32.mrf.mxu1 }
 0xe2c   :  { %v1583_v21 = vadd.f32 %v2218_v16, %v1582_v1  ;;  %v2244_v1 = vld [vmem:[%s3438_s2 + $0x14] ss:$0 sm:$0xff] }
 0xe2d   :  { %v2507_v22 = vpop.f32.mrf.mxu1 }
 0xe2e   :  { %v3310_v8 = vadd.f32 %v1583_v21, %v3244_v38 }
 0xe30   :  { %v1608_v59 = vpack.c.bf16 %v3310_v8, %v3307_v23 }
 0xe32   :  { %2513 = vmatmul.mubr.msk.bf16.vlgmr.msra.gmra.mxu0 %vm98_vm2, %v1608_v59 }
 0xe33   :  { %2536 = vmatprep.mubr.msk.bf16.mxu0 %vm2717_vm0, %v2716_v0  ;;  %2529 = vmatpush3.bf16.msra.mxu0 %v2628_v5 }
 0xe34   :  { %2530 = vmatprep.subr.bf16.mxu0 %v2716_v0 }
 0xe37   :  { %2531 = vmatpush3.bf16.msra.mxu0 %v2629_v35 }
 0xe38   :  { %2532 = vmatprep.subr.bf16.mxu0 %v2716_v0 }
 0xe3b   :  { %2533 = vmatpush3.bf16.msra.mxu0 %v2630_v39 }
 0xe3c   :  { %2534 = vmatprep.subr.bf16.mxu0 %v2716_v0 }
 0xe3f   :  { %2535 = vmatpush3.bf16.msra.mxu0 %v2631_v46 }
 0xe40   :  { %2548 = vmatprep.subr.bf16.mxu0 %v2716_v0 }
 0xef2   :  { %v1663_v25 = vpop.f32.mrf.mxu0 }
 0xef3   :  { %v1664_v28 = vadd.f32 %v2224_v24, %v1663_v25 }
 0xef4   :  { %v2514_v27 = vpop.f32.mrf.mxu0 }
 0xef5   :  { %v1670_v26 = vmax.f32 %v1664_v28, 0.0 }
 0xef6   :  { %v1666_v15 = vpop.f32.mrf.mxu0 }
 0xef7   :  { %v1667_v31 = vadd.f32 %v2224_v24, %v1666_v15  ;;  %v2250_v24 = vld [vmem:[%s3438_s2 + $0x1c] ss:$0 sm:$0xff] }
 0xef8   :  { %v2515_v20 = vpop.f32.mrf.mxu0 }
 0xef9   :  { %v1671_v33 = vmax.f32 %v1667_v31, 0.0 }
 0xefb   :  { %v1672_v30 = vpack.c.bf16 %v1671_v33, %v1670_v26 }
 0xefd   :  { %2525 = vmatmul.mubr.msk.bf16.vlgmr.msra.gmra.mxu1 %vm993_vm3, %v1672_v30 }
 0xefe   :  { %2544 = vmatprep.mubr.msk.bf16.mxu1 %vm2717_vm0, %v2716_v0  ;;  %2541 = vmatpush3.bf16.msra.mxu1 %v2632_v49 }
 0xeff   :  { %2542 = vmatprep.subr.bf16.mxu1 %v2716_v0 }
 0xf02   :  { %2543 = vmatpush3.bf16.msra.mxu1 %v2633_v51  ;;  %v2256_v51 = vld [vmem:[%s3438_s2 + $0x5] ss:$0 sm:$0xff] }
 0xf03   :  { %2560 = vmatprep.subr.bf16.mxu1 %v2716_v0 }
 0xfbd   :  { %v1739_v32 = vpop.f32.mrf.mxu1 }
 0xfbe   :  { %v1740_v43 = vadd.f32 %v2228_v40, %v1739_v32  ;;  %v2643_v32 = vld [vmem:[%s3436_s1 + $0x28] sm:$0xff]  }
 0xfbf   :  { %v2526_v41 = vpop.f32.mrf.mxu1 }
 0xfc0   :  { %v1746_v34 = vmax.f32 %v1740_v43, 0.0 }
 0xfc1   :  { %v1742_v38 = vpop.f32.mrf.mxu1 }
 0xfc2   :  { %v1743_v29 = vadd.f32 %v2228_v40, %v1742_v38  ;;  %v2642_v40 = vld [vmem:[%s3436_s1 + $0x30] sm:$0xff]  }
 0xfc3   :  { %v2527_v44 = vpop.f32.mrf.mxu1 }
 0xfc4   :  { %v1747_v36 = vmax.f32 %v1743_v29, 0.0 }
 0xfc6   :  { %v1748_v48 = vpack.c.bf16 %v1747_v36, %v1746_v34 }
 0xfc8   :  { %2537 = vmatmul.mubr.msk.bf16.vlgmr.msra.gmra.mxu0 %vm993_vm3, %v1748_v48 }
 0xfc9   :  { %2556 = vmatprep.mubr.msk.bf16.mxu0 %vm2717_vm0, %v2716_v0  ;;  %2549 = vmatpush3.bf16.msra.mxu0 %v2634_v53 }
 0xfca   :  { %2550 = vmatprep.subr.bf16.mxu0 %v2716_v0 }
 0xfcd   :  { %2551 = vmatpush3.bf16.msra.mxu0 %v2635_v63 }
 0xfce   :  { %2552 = vmatprep.subr.bf16.mxu0 %v2716_v0 }
 0xfd1   :  { %2553 = vmatpush3.bf16.msra.mxu0 %v2636_v12 }
 0xfd2   :  { %2554 = vmatprep.subr.bf16.mxu0 %v2716_v0 }
 0xfd5   :  { %2555 = vmatpush3.bf16.msra.mxu0 %v2637_v2 }
 0xfd6   :  { %2572 = vmatprep.subr.bf16.mxu0 %v2716_v0 }
0x1088   :  { %v1815_v54 = vpop.f32.mrf.mxu0 }
0x1089   :  { %v1816_v58 = vadd.f32 %v2234_v45, %v1815_v54 }
0x108a   :  { %v2538_v56 = vpop.f32.mrf.mxu0 }
0x108b   :  { %v1822_v62 = vadd.f32 %v1816_v58, %v3307_v23 }
0x108c   :  { %v1818_v47 = vpop.f32.mrf.mxu0 }
0x108d   :  { %v1819_v50 = vadd.f32 %v2234_v45, %v1818_v47 }
0x108e   :  { %v2539_v60 = vpop.f32.mrf.mxu0 }
0x108f   :  { %v1823_v37 = vadd.f32 %v1819_v50, %v3310_v8 }
0x1091   :  { %v1844_v52 = vpack.c.bf16 %v1823_v37, %v1822_v62 }
0x1093   :  { %2545 = vmatmul.mubr.msk.bf16.vlgmr.msra.gmra.mxu1 %vm98_vm2, %v1844_v52 }
0x1094   :  { %2568 = vmatprep.mubr.msk.bf16.mxu1 %vm2717_vm0, %v2716_v0  ;;  %2561 = vmatpush3.bf16.msra.mxu1 %v2638_v55 }
0x1095   :  { %2562 = vmatprep.subr.bf16.mxu1 %v2716_v0 }
0x1098   :  { %2563 = vmatpush3.bf16.msra.mxu1 %v2639_v42 }
0x1099   :  { %2564 = vmatprep.subr.bf16.mxu1 %v2716_v0 }
0x109c   :  { %2565 = vmatpush3.bf16.msra.mxu1 %v2640_v17 }
0x109d   :  { %2566 = vmatprep.subr.bf16.mxu1 %v2716_v0 }
0x10a0   :  { %2567 = vmatpush3.bf16.msra.mxu1 %v2641_v10 }
0x1153   :  { %v1899_v6 = vpop.f32.mrf.mxu1 }
0x1154   :  { %v1900_v57 = vadd.f32 %v2240_v3, %v1899_v6 }
0x1155   :  { %v2546_v7 = vpop.f32.mrf.mxu1 }
0x1156   :  { %v1906_v61 = vmax.f32 %v1900_v57, 0.0 }
0x1157   :  { %v1902_v9 = vpop.f32.mrf.mxu1 }
0x1158   :  { %v1903_v11 = vadd.f32 %v2240_v3, %v1902_v9 }
0x1159   :  { %v2547_v13 = vpop.f32.mrf.mxu1 }
0x115a   :  { %v1907_v4 = vmax.f32 %v1903_v11, 0.0 }
0x115c   :  { %v1908_v16 = vpack.c.bf16 %v1907_v4, %v1906_v61 }
0x115e   :  { %2557 = vmatmul.mubr.msk.bf16.vlgmr.msra.gmra.mxu0 %vm993_vm3, %v1908_v16 }
0x115f   :  { %2576 = vmatprep.mubr.msk.bf16.mxu0 %vm2717_vm0, %v2716_v0  ;;  %2573 = vmatpush3.bf16.msra.mxu0 %v2642_v40 }
0x1160   :  { %2574 = vmatprep.subr.bf16.mxu0 %v2716_v0 }
0x1163   :  { %2575 = vmatpush3.bf16.msra.mxu0 %v2643_v32 }
0x121e   :  { %v1975_v21 = vpop.f32.mrf.mxu0 }
0x121f   :  { %v1976_v23 = vadd.f32 %v2244_v1, %v1975_v21 }
0x1220   :  { %v2558_v22 = vpop.f32.mrf.mxu0 }
0x1221   :  { %v1982_v14 = vmax.f32 %v1976_v23, 0.0 }
0x1222   :  { %v1978_v8 = vpop.f32.mrf.mxu0 }
0x1223   :  { %v1979_v59 = vadd.f32 %v2244_v1, %v1978_v8 }
0x1224   :  { %v2559_v18 = vpop.f32.mrf.mxu0 }
0x1225   :  { %v1983_v19 = vmax.f32 %v1979_v59, 0.0 }
0x1227   :  { %v1984_v5 = vpack.c.bf16 %v1983_v19, %v1982_v14 }
0x1229   :  { %2569 = vmatmul.mubr.msk.bf16.vlgmr.msra.gmra.mxu1 %vm993_vm3, %v1984_v5 }
0x12e9   :  { %v2051_v25 = vpop.f32.mrf.mxu1 }
0x12ea   :  { %v2052_v27 = vadd.f32 %v2250_v24, %v2051_v25 }
0x12eb   :  { %v2570_v28 = vpop.f32.mrf.mxu1 }
0x12ec   :  { %v2058_v15 = vadd.f32 %v2052_v27, %v1822_v62 }
0x12ed   :  { %v2054_v31 = vpop.f32.mrf.mxu1 }
0x12ee   :  { %v2055_v20 = vadd.f32 %v2250_v24, %v2054_v31  ;;  %v2060_v26 = vmul.f32 %v2058_v15, %v2058_v15 }
0x12ef   :  { %v2571_v33 = vpop.f32.mrf.mxu1 }
0x12f0   :  { %v2059_v30 = vadd.f32 %v2055_v20, %v1823_v37  ;;  %v2062_v35 = vsel %vm98_vm2, %v2060_v26, 0.0 }
0x12f1   :  { %2063 = vadd.xlane.f32.xlu1 %v2062_v35 }
0x12f2   :  { %v2061_v39 = vmul.f32 %v2059_v30, %v2059_v30 }
0x12f4   :  { %v2065_v46 = vsel %vm98_vm2, %v2061_v39, 0.0 }
0x12f5   :  { %2066 = vadd.xlane.f32.xlu1 %v2065_v46 }
0x137a   :  { %v2064_v41 = vpop.xlane.xlu1 %2063 }
0x137b   :  { %v2068_v43 = vmax.f32 %v2064_v41, 1e-24 }
0x137d   :  { %2712 = vrsqrt.f32 %v2068_v43 }
0x137e   :  { %v2067_v38 = vpop.xlane.xlu1 %2066 }
0x137f   :  { %v2069_v29 = vmax.f32 %v2067_v38, 1e-24 }
0x1381   :  { %2714 = vrsqrt.f32 %v2069_v29 }
0x138a   :  { %v2713_v44 = vpop.eup %2712 }
0x138b   :  { %v2072_v36 = vmul.f32 %v2713_v44, %v2058_v15 }
0x138e   :  { %v2715_v34 = vpop.eup %2714 }
0x138f   :  { %v2073_v48 = vmul.f32 %v2715_v34, %v2059_v30 }
0x1391   :  { %v2078_v49 = vpack.c.bf16 %v2073_v48, %v2072_v36 }
0x1393   :  { %2577 = vmatmul.mubr.msk.bf16.vlgmr.msra.gmra.mxu0 %vm98_vm2, %v2078_v49 }
0x1453   :  { %v2133_v53 = vpop.f32.mrf.mxu0 }
0x1454   :  { %v2134_v0 = vadd.f32 %v2256_v51, %v2133_v53 }
0x1455   :  { %v2578_v45 = vpop.f32.mrf.mxu0 }
0x1456   :  { %2141 = vst.msk [vmem:[%s3439_s3] sm:$0xff] %vm2140_vm4, %v2134_v0 }
0x1457   :  { %v2136_v54 = vpop.f32.mrf.mxu0 }
0x1458   :  { %v2137_v56 = vadd.f32 %v2256_v51, %v2136_v54 }
0x1459   :  { %v2579_v58 = vpop.f32.mrf.mxu0 }
0x145a   :  { %2142 = vst.msk [vmem:[%s3439_s3 + $0x8] sm:$0xff] %vm2140_vm4, %v2137_v56 }

</bundles_post_ra>
